<compile_context>
chip_gen: v7x
topology: tpu7x:2x2x1
jax: 0.10.0
libtpu: 0.0.40
codegen_flags: <defaults>
</compile_context>

<pallas_src>
import jax
import jax.numpy as jnp
from jax.experimental import pallas as pl
from jax.experimental.pallas import tpu as pltpu


def _round_up(x, m):
    return ((x + m - 1) // m) * m


def _vae_kernel(x_ref, eps_ref,
                w1_ref, b1_ref,
                wms_ref, bms_ref,
                w2_ref, b2_ref,
                w3_ref, b3_ref,
                xrec_ref, musig_ref):
    z_pad = eps_ref.shape[1]

    x = x_ref[...]

    # encoder: h = relu(x @ W1 + b1)   (f32 accumulation on MXU)
    h = jnp.dot(x, w1_ref[...], preferred_element_type=jnp.float32) + b1_ref[...]
    h = jnp.maximum(h, 0.0)

    # fused mu/sigma head: single matmul into a packed (TILE_B, 2*z_pad) slab
    musig = (jnp.dot(h.astype(wms_ref.dtype), wms_ref[...],
                     preferred_element_type=jnp.float32) + bms_ref[...])
    mu = musig[:, :z_pad]
    sigma = musig[:, z_pad:]

    # reparameterization: z = mu + sigma * eps,  eps ~ U[0,1) (torch.rand_like)
    z = (mu + sigma * eps_ref[...]).astype(w2_ref.dtype)

    # decoder: h2 = relu(z @ W2 + b2); x_recons = sigmoid(h2 @ W3 + b3)
    h2 = jnp.dot(z, w2_ref[...], preferred_element_type=jnp.float32) + b2_ref[...]
    h2 = jnp.maximum(h2, 0.0).astype(w3_ref.dtype)
    logits = (jnp.dot(h2, w3_ref[...], preferred_element_type=jnp.float32)
              + b3_ref[...])

    # sigmoid via EUP exp + approx reciprocal (EUP slot -> nearly free epilogue)
    t = jnp.exp(-logits)
    xrec_ref[...] = pl.reciprocal(1.0 + t, approx=True)

    musig_ref[...] = musig


def vae_forward(x, eps, params, *, tile_b=256, compute_dtype=jnp.float32):
    """x: (B, input_dim) f32, eps: (B, z_dim) f32, params: dict of weights.

    Returns (x_recons, mu, sigma) with the original (unpadded) shapes.
    """
    B, input_dim = x.shape
    z_dim = eps.shape[1]
    hidden_dim = params["w1"].shape[1]

    # ---- padded (lane-dense) sizes ----------------------------------------
    d_in = _round_up(input_dim, 128)
    d_hid = _round_up(hidden_dim, 128)
    d_z = _round_up(z_dim, 128)

    tile_b = _round_up(max(8, min(tile_b, _round_up(B, 8))), 8)
    Bp = _round_up(B, tile_b)
    grid = (Bp // tile_b,)

    f32 = jnp.float32

    def pad2(a, rows, cols, dtype):
        r, c = a.shape
        return jnp.pad(a, ((0, rows - r), (0, cols - c))).astype(dtype)

    # activations
    x_p = pad2(x, Bp, d_in, compute_dtype)
    eps_p = pad2(eps, Bp, d_z, f32)

    # weights (already stored as (in, out)); zero padding preserves results.
    w1p = pad2(params["w1"], d_in, d_hid, compute_dtype)
    b1p = pad2(params["b1"], 1, d_hid, f32)
    # fused mu/sigma head: (d_hid, 2*d_z), mu in [:d_z], sigma in [d_z:]
    wmsp = jnp.concatenate(
        [pad2(params["w_mu"], d_hid, d_z, compute_dtype),
         pad2(params["w_sigma"], d_hid, d_z, compute_dtype)], axis=1)
    bmsp = jnp.concatenate(
        [pad2(params["b_mu"], 1, d_z, f32),
         pad2(params["b_sigma"], 1, d_z, f32)], axis=1)
    w2p = pad2(params["w2"], d_z, d_hid, compute_dtype)
    b2p = pad2(params["b2"], 1, d_hid, f32)
    w3p = pad2(params["w3"], d_hid, d_in, compute_dtype)
    b3p = pad2(params["b3"], 1, d_in, f32)

    const_args = (w1p, b1p, wmsp, bmsp, w2p, b2p, w3p, b3p)

    # ---- specs -------------------------------------------------------------
    def row_spec(d):
        return pl.BlockSpec((tile_b, d), lambda i: (i, 0))

    def const_spec(a):
        return pl.BlockSpec(a.shape, lambda i: (0, 0))  # resident, no re-fetch

    in_specs = [row_spec(d_in), row_spec(d_z)] + [const_spec(a) for a in const_args]
    out_specs = (row_spec(d_in), row_spec(2 * d_z))
    out_shape = (
        jax.ShapeDtypeStruct((Bp, d_in), f32),       # x_recons (padded)
        jax.ShapeDtypeStruct((Bp, 2 * d_z), f32),    # packed [mu | sigma]
    )

    # ---- VMEM budget + cost hint -------------------------------------------
    weight_bytes = sum(int(a.size) * a.dtype.itemsize for a in const_args)
    io_tile_bytes = tile_b * (d_in * x_p.dtype.itemsize + d_z * 4
                              + d_in * 4 + 2 * d_z * 4)
    interm_bytes = tile_b * (3 * d_hid + 4 * d_z) * 4
    vmem_limit = weight_bytes + 2 * io_tile_bytes + interm_bytes + (8 << 20)
    vmem_limit = int(min(max(vmem_limit, 16 << 20), 64 << 20))  # fits v7x too

    flops = 2 * Bp * (d_in * d_hid + d_hid * 2 * d_z + d_z * d_hid + d_hid * d_in)
    transcendentals = 2 * Bp * d_in  # exp + reciprocal in the sigmoid epilogue
    bytes_accessed = (int(x_p.size) * x_p.dtype.itemsize
                      + int(eps_p.size) * 4
                      + weight_bytes
                      + Bp * (d_in + 2 * d_z) * 4)
    cost = pl.CostEstimate(flops=int(flops),
                           transcendentals=int(transcendentals),
                           bytes_accessed=int(bytes_accessed))

    xrec_p, musig_p = pl.pallas_call(
        _vae_kernel,
        out_shape=out_shape,
        grid=grid,
        in_specs=in_specs,
        out_specs=out_specs,
        compiler_params=pltpu.CompilerParams(
            dimension_semantics=("parallel",),       # megacore on v7x
            vmem_limit_bytes=vmem_limit),
        cost_estimate=cost,
    )(x_p, eps_p, *const_args)

    x_rec = xrec_p[:B, :input_dim]
    mu = musig_p[:B, :z_dim]
    sigma = musig_p[:B, d_z:d_z + z_dim]
    return x_rec, mu, sigma


def init_params(key, input_dim, hidden_dim, z_dim):
    """Deterministic synthetic weights, PyTorch nn.Linear-style init.
    Stored already transposed: (in_features, out_features)."""
    ks = jax.random.split(key, 10)

    def lin(kw, kb, fan_in, fan_out):
        scale = 1.0 / jnp.sqrt(jnp.float32(fan_in))
        w = jax.random.uniform(kw, (fan_in, fan_out), jnp.float32, -scale, scale)
        b = jax.random.uniform(kb, (1, fan_out), jnp.float32, -scale, scale)
        return w, b

    w1, b1 = lin(ks[0], ks[1], input_dim, hidden_dim)       # image_2hid
    w_mu, b_mu = lin(ks[2], ks[3], hidden_dim, z_dim)        # hid_2mu
    w_sig, b_sig = lin(ks[4], ks[5], hidden_dim, z_dim)      # hid_2sigma
    w2, b2 = lin(ks[6], ks[7], z_dim, hidden_dim)            # z_2hid
    w3, b3 = lin(ks[8], ks[9], hidden_dim, input_dim)        # hid_2img
    return dict(w1=w1, b1=b1, w_mu=w_mu, b_mu=b_mu,
                w_sigma=w_sig, b_sigma=b_sig,
                w2=w2, b2=b2, w3=w3, b3=b3)


def _reference(x, eps, p):
    """Pure-JAX reference mirroring the PyTorch forward."""
    h = jax.nn.relu(x @ p["w1"] + p["b1"])
    mu = h @ p["w_mu"] + p["b_mu"]
    sigma = h @ p["w_sigma"] + p["b_sigma"]
    z = mu + sigma * eps
    h2 = jax.nn.relu(z @ p["w2"] + p["b2"])
    x_rec = jax.nn.sigmoid(h2 @ p["w3"] + p["b3"])
    return x_rec, mu, sigma


if __name__ == "__main__":
    # Module defaults: hidden_dim=200, z_dim=20; MNIST-style input_dim=784.
    input_dim, hidden_dim, z_dim = 784, 200, 20
    batch = 16

    key = jax.random.PRNGKey(0)
    k_params, k_x, k_eps = jax.random.split(key, 3)

    params = init_params(k_params, input_dim, hidden_dim, z_dim)
    x = jax.random.normal(k_x, (batch, input_dim), jnp.float32)
    # torch.rand_like -> uniform [0, 1)
    eps = jax.random.uniform(k_eps, (batch, z_dim), jnp.float32)

    x_rec_r, mu_r, sigma_r = _reference(x, eps, params)

    # f32 matmul path (strict check; small tile to exercise the batch grid).
    x_rec, mu, sigma = jax.block_until_ready(
        vae_forward(x, eps, params, tile_b=8, compute_dtype=jnp.float32))
    assert jnp.allclose(mu, mu_r, atol=1e-4, rtol=1e-4)
    assert jnp.allclose(sigma, sigma_r, atol=1e-4, rtol=1e-4)
    # approx reciprocal in the sigmoid epilogue -> slightly looser tolerance
    assert jnp.allclose(x_rec, x_rec_r, atol=2e-3, rtol=2e-3)

    # bf16 matmul-input path (f32 accumulation) for v6e/v7x bandwidth savings.
    x_rec_b, mu_b, sigma_b = jax.block_until_ready(
        vae_forward(x, eps, params, tile_b=8, compute_dtype=jnp.bfloat16))
    assert jnp.allclose(mu_b, mu_r, atol=5e-2, rtol=5e-2)
    assert jnp.allclose(sigma_b, sigma_r, atol=5e-2, rtol=5e-2)
    assert jnp.allclose(x_rec_b, x_rec_r, atol=5e-2, rtol=5e-2)

    print("KERNEL_OK")
</pallas_src>

<mosaic_0001>
module attributes {stable_mosaic.version = 11 : i64} {
  func.func @_vae_kernel(%arg0: i32, %arg1: memref<8x896xf32, #tpu.memory_space<vmem>>, %arg2: memref<8x128xf32, #tpu.memory_space<vmem>>, %arg3: memref<896x256xf32, #tpu.memory_space<vmem>>, %arg4: memref<1x256xf32, #tpu.memory_space<vmem>>, %arg5: memref<256x256xf32, #tpu.memory_space<vmem>>, %arg6: memref<1x256xf32, #tpu.memory_space<vmem>>, %arg7: memref<128x256xf32, #tpu.memory_space<vmem>>, %arg8: memref<1x256xf32, #tpu.memory_space<vmem>>, %arg9: memref<256x896xf32, #tpu.memory_space<vmem>>, %arg10: memref<1x896xf32, #tpu.memory_space<vmem>>, %arg11: memref<8x896xf32, #tpu.memory_space<vmem>>, %arg12: memref<8x256xf32, #tpu.memory_space<vmem>>) attributes {dimension_semantics = [#tpu.dimension_semantics<parallel>], iteration_bounds = array<i64: 2>, scalar_prefetch = 0 : i64, scratch_operands = 0 : i64, tpu.core_type = #tpu.core_type<tc>, window_params = [{transform_indices = @transform_0, window_bounds = array<i64: 8, 896>}, {transform_indices = @transform_1, window_bounds = array<i64: 8, 128>}, {pipeline_mode = #tpu.pipeline_mode<synchronous>, transform_indices = @transform_2, window_bounds = array<i64: 896, 256>}, {pipeline_mode = #tpu.pipeline_mode<synchronous>, transform_indices = @transform_3, window_bounds = array<i64: 1, 256>}, {pipeline_mode = #tpu.pipeline_mode<synchronous>, transform_indices = @transform_4, window_bounds = array<i64: 256, 256>}, {pipeline_mode = #tpu.pipeline_mode<synchronous>, transform_indices = @transform_5, window_bounds = array<i64: 1, 256>}, {pipeline_mode = #tpu.pipeline_mode<synchronous>, transform_indices = @transform_6, window_bounds = array<i64: 128, 256>}, {pipeline_mode = #tpu.pipeline_mode<synchronous>, transform_indices = @transform_7, window_bounds = array<i64: 1, 256>}, {pipeline_mode = #tpu.pipeline_mode<synchronous>, transform_indices = @transform_8, window_bounds = array<i64: 256, 896>}, {pipeline_mode = #tpu.pipeline_mode<synchronous>, transform_indices = @transform_9, window_bounds = array<i64: 1, 896>}, {transform_indices = @transform_10, window_bounds = array<i64: 8, 896>}, {transform_indices = @transform_11, window_bounds = array<i64: 8, 256>}]} {
    %c0 = arith.constant 0 : index
    %c0_0 = arith.constant 0 : index
    %0 = vector.load %arg1[%c0, %c0_0] : memref<8x896xf32, #tpu.memory_space<vmem>>, vector<8x896xf32>
    %c0_1 = arith.constant 0 : index
    %c0_2 = arith.constant 0 : index
    %1 = vector.load %arg3[%c0_1, %c0_2] : memref<896x256xf32, #tpu.memory_space<vmem>>, vector<896x256xf32>
    %cst = arith.constant dense<0.000000e+00> : vector<8x256xf32>
    %2 = tpu.matmul %0, %1, %cst {dimension_numbers = #tpu.dot_dimension_numbers<[1], [0], [0], [1], [0, 0, 1, 1], [], []>} : vector<8x896xf32>, vector<896x256xf32>, vector<8x256xf32> -> vector<8x256xf32>
    %c0_3 = arith.constant 0 : index
    %c0_4 = arith.constant 0 : index
    %3 = vector.load %arg4[%c0_3, %c0_4] : memref<1x256xf32, #tpu.memory_space<vmem>>, vector<1x256xf32>
    %4 = vector.broadcast %3 : vector<1x256xf32> to vector<8x256xf32>
    %5 = arith.addf %2, %4 : vector<8x256xf32>
    %cst_5 = arith.constant 0.000000e+00 : f32
    %6 = vector.broadcast %cst_5 : f32 to vector<8x256xf32>
    %7 = arith.maximumf %5, %6 : vector<8x256xf32>
    %c0_6 = arith.constant 0 : index
    %c0_7 = arith.constant 0 : index
    %8 = vector.load %arg5[%c0_6, %c0_7] : memref<256x256xf32, #tpu.memory_space<vmem>>, vector<256x256xf32>
    %cst_8 = arith.constant dense<0.000000e+00> : vector<8x256xf32>
    %9 = tpu.matmul %7, %8, %cst_8 {dimension_numbers = #tpu.dot_dimension_numbers<[1], [0], [0], [1], [0, 0, 1, 1], [], []>} : vector<8x256xf32>, vector<256x256xf32>, vector<8x256xf32> -> vector<8x256xf32>
    %c0_9 = arith.constant 0 : index
    %c0_10 = arith.constant 0 : index
    %10 = vector.load %arg6[%c0_9, %c0_10] : memref<1x256xf32, #tpu.memory_space<vmem>>, vector<1x256xf32>
    %11 = vector.broadcast %10 : vector<1x256xf32> to vector<8x256xf32>
    %12 = arith.addf %9, %11 : vector<8x256xf32>
    %13 = vector.extract_strided_slice %12 {offsets = [0, 0], sizes = [8, 128], strides = [1, 1]} : vector<8x256xf32> to vector<8x128xf32>
    %14 = vector.extract_strided_slice %12 {offsets = [0, 128], sizes = [8, 128], strides = [1, 1]} : vector<8x256xf32> to vector<8x128xf32>
    %c0_11 = arith.constant 0 : index
    %c0_12 = arith.constant 0 : index
    %15 = vector.load %arg2[%c0_11, %c0_12] : memref<8x128xf32, #tpu.memory_space<vmem>>, vector<8x128xf32>
    %16 = arith.mulf %14, %15 : vector<8x128xf32>
    %17 = arith.addf %13, %16 : vector<8x128xf32>
    %c0_13 = arith.constant 0 : index
    %c0_14 = arith.constant 0 : index
    %18 = vector.load %arg7[%c0_13, %c0_14] : memref<128x256xf32, #tpu.memory_space<vmem>>, vector<128x256xf32>
    %cst_15 = arith.constant dense<0.000000e+00> : vector<8x256xf32>
    %19 = tpu.matmul %17, %18, %cst_15 {dimension_numbers = #tpu.dot_dimension_numbers<[1], [0], [0], [1], [0, 0, 1, 1], [], []>} : vector<8x128xf32>, vector<128x256xf32>, vector<8x256xf32> -> vector<8x256xf32>
    %c0_16 = arith.constant 0 : index
    %c0_17 = arith.constant 0 : index
    %20 = vector.load %arg8[%c0_16, %c0_17] : memref<1x256xf32, #tpu.memory_space<vmem>>, vector<1x256xf32>
    %21 = vector.broadcast %20 : vector<1x256xf32> to vector<8x256xf32>
    %22 = arith.addf %19, %21 : vector<8x256xf32>
    %cst_18 = arith.constant 0.000000e+00 : f32
    %23 = vector.broadcast %cst_18 : f32 to vector<8x256xf32>
    %24 = arith.maximumf %22, %23 : vector<8x256xf32>
    %c0_19 = arith.constant 0 : index
    %c0_20 = arith.constant 0 : index
    %25 = vector.load %arg9[%c0_19, %c0_20] : memref<256x896xf32, #tpu.memory_space<vmem>>, vector<256x896xf32>
    %cst_21 = arith.constant dense<0.000000e+00> : vector<8x896xf32>
    %26 = tpu.matmul %24, %25, %cst_21 {dimension_numbers = #tpu.dot_dimension_numbers<[1], [0], [0], [1], [0, 0, 1, 1], [], []>} : vector<8x256xf32>, vector<256x896xf32>, vector<8x896xf32> -> vector<8x896xf32>
    %c0_22 = arith.constant 0 : index
    %c0_23 = arith.constant 0 : index
    %27 = vector.load %arg10[%c0_22, %c0_23] : memref<1x896xf32, #tpu.memory_space<vmem>>, vector<1x896xf32>
    %28 = vector.broadcast %27 : vector<1x896xf32> to vector<8x896xf32>
    %29 = arith.addf %26, %28 : vector<8x896xf32>
    %cst_24 = arith.constant 0.000000e+00 : f32
    %30 = vector.broadcast %cst_24 : f32 to vector<8x896xf32>
    %31 = arith.subf %30, %29 : vector<8x896xf32>
    %32 = math.exp %31 : vector<8x896xf32>
    %cst_25 = arith.constant 1.000000e+00 : f32
    %33 = vector.broadcast %cst_25 : f32 to vector<8x896xf32>
    %34 = arith.addf %33, %32 : vector<8x896xf32>
    %35 = tpu.reciprocal %34 {approx = true} : vector<8x896xf32> -> vector<8x896xf32>
    %c0_26 = arith.constant 0 : index
    %c0_27 = arith.constant 0 : index
    %36 = vector.load %arg11[%c0_26, %c0_27] : memref<8x896xf32, #tpu.memory_space<vmem>>, vector<8x896xf32>
    tpu.vector_store %arg11[%c0_26, %c0_27], %35 {strides = array<i32>} : memref<8x896xf32, #tpu.memory_space<vmem>>, vector<8x896xf32>,
    %c0_28 = arith.constant 0 : index
    %c0_29 = arith.constant 0 : index
    %37 = vector.load %arg12[%c0_28, %c0_29] : memref<8x256xf32, #tpu.memory_space<vmem>>, vector<8x256xf32>
    tpu.vector_store %arg12[%c0_28, %c0_29], %12 {strides = array<i32>} : memref<8x256xf32, #tpu.memory_space<vmem>>, vector<8x256xf32>,
    return
  }
  func.func @transform_0(%arg0: i32) -> (i32, i32) {
    %c0_i32 = arith.constant 0 : i32
    %c0_i32_0 = arith.constant 0 : i32
    return %arg0, %c0_i32 : i32, i32
  }
  func.func @transform_1(%arg0: i32) -> (i32, i32) {
    %c0_i32 = arith.constant 0 : i32
    %c0_i32_0 = arith.constant 0 : i32
    return %arg0, %c0_i32 : i32, i32
  }
  func.func @transform_2(%arg0: i32) -> (i32, i32) {
    %c0_i32 = arith.constant 0 : i32
    %c0_i32_0 = arith.constant 0 : i32
    %c0_i32_1 = arith.constant 0 : i32
    return %c0_i32, %c0_i32_0 : i32, i32
  }
  func.func @transform_3(%arg0: i32) -> (i32, i32) {
    %c0_i32 = arith.constant 0 : i32
    %c0_i32_0 = arith.constant 0 : i32
    %c0_i32_1 = arith.constant 0 : i32
    return %c0_i32, %c0_i32_0 : i32, i32
  }
  func.func @transform_4(%arg0: i32) -> (i32, i32) {
    %c0_i32 = arith.constant 0 : i32
    %c0_i32_0 = arith.constant 0 : i32
    %c0_i32_1 = arith.constant 0 : i32
    return %c0_i32, %c0_i32_0 : i32, i32
  }
  func.func @transform_5(%arg0: i32) -> (i32, i32) {
    %c0_i32 = arith.constant 0 : i32
    %c0_i32_0 = arith.constant 0 : i32
    %c0_i32_1 = arith.constant 0 : i32
    return %c0_i32, %c0_i32_0 : i32, i32
  }
  func.func @transform_6(%arg0: i32) -> (i32, i32) {
    %c0_i32 = arith.constant 0 : i32
    %c0_i32_0 = arith.constant 0 : i32
    %c0_i32_1 = arith.constant 0 : i32
    return %c0_i32, %c0_i32_0 : i32, i32
  }
  func.func @transform_7(%arg0: i32) -> (i32, i32) {
    %c0_i32 = arith.constant 0 : i32
    %c0_i32_0 = arith.constant 0 : i32
    %c0_i32_1 = arith.constant 0 : i32
    return %c0_i32, %c0_i32_0 : i32, i32
  }
  func.func @transform_8(%arg0: i32) -> (i32, i32) {
    %c0_i32 = arith.constant 0 : i32
    %c0_i32_0 = arith.constant 0 : i32
    %c0_i32_1 = arith.constant 0 : i32
    return %c0_i32, %c0_i32_0 : i32, i32
  }
  func.func @transform_9(%arg0: i32) -> (i32, i32) {
    %c0_i32 = arith.constant 0 : i32
    %c0_i32_0 = arith.constant 0 : i32
    %c0_i32_1 = arith.constant 0 : i32
    return %c0_i32, %c0_i32_0 : i32, i32
  }
  func.func @transform_10(%arg0: i32) -> (i32, i32) {
    %c0_i32 = arith.constant 0 : i32
    %c0_i32_0 = arith.constant 0 : i32
    return %arg0, %c0_i32 : i32, i32
  }
  func.func @transform_11(%arg0: i32) -> (i32, i32) {
    %c0_i32 = arith.constant 0 : i32
    %c0_i32_0 = arith.constant 0 : i32
    return %arg0, %c0_i32 : i32, i32
  }
}

</mosaic_0001>

<bundles_post_ra>
// kernel: tpu_custom_call.1
= control target key start
LH: loop header
LB: loop body
LE: loop exit
PB: predicated region body
PF: predicated region fallthrough
CT: control target
= control target key end

     0   :  { %s3640_s0 = inlined_call_operand.hbm [shape: f32[16,896], index: 0, kind: input, shape index: {}]   ;;  %s3641_s1 = inlined_call_operand.hbm [shape: f32[16,128], index: 1, kind: input, shape index: {}]   ;;  %s3642_s2 = inlined_call_operand.hbm [shape: f32[896,256], index: 2, kind: input, shape index: {}]   ;;  %s3643_s3 = inlined_call_operand.vmem [shape: f32[1,256], index: 3, kind: input, shape index: {}]   ;;  %s3644_s4 = inlined_call_operand.hbm [shape: f32[256,256], index: 4, kind: input, shape index: {}]   ;;  %s3645_s5 = inlined_call_operand.vmem [shape: f32[1,256], index: 5, kind: input, shape index: {}]   ;;  %s3646_s6 = inlined_call_operand.hbm [shape: f32[128,256], index: 6, kind: input, shape index: {}]   ;;  %s3647_s7 = inlined_call_operand.vmem [shape: f32[1,256], index: 7, kind: input, shape index: {}]   ;;  %s3648_s8 = inlined_call_operand.hbm [shape: f32[256,896], index: 8, kind: input, shape index: {}]   ;;  %s3649_s9 = inlined_call_operand.vmem [shape: f32[1,896], index: 9, kind: input, shape index: {}]   ;;  %s3650_s10 = inlined_call_operand.hbm [shape: f32[16,896], index: 10, kind: output, shape index: {0}]   ;;  %s3651_s11 = inlined_call_operand.hbm [shape: f32[16,256], index: 11, kind: output, shape index: {1}]  }
   0x1   :  { %3658 = sst [smem:[#allocation23_spill]] %s3640_s0 }
   0x2   :  { %3659 = sst [smem:[#allocation24_spill]] %s3642_s2 }
   0x3   :  { %3660 = sst [smem:[#allocation25_spill]] %s3644_s4 }
   0x4   :  { %3661 = sst [smem:[#allocation26_spill]] %s3646_s6 }
   0x5   :  { %3662 = sst [smem:[#allocation27_spill]] %s3649_s9 }
   0x6   :  { %3663 = sst [smem:[#allocation28_spill]] %s3650_s10 }
   0x7   :  { %3664 = sst [smem:[#allocation29_spill]] %s3651_s11 }
   0x8   :  { %17 = vsyncpa [#allocation3], 0 }
   0x9   :  { %19 = vsyncpa [#allocation3 + $0x1], 0 }
   0xa   :  { %20 = vsyncpa [#allocation6], 0 }
   0xb   :  { %22 = vsyncpa [#allocation6 + $0x1], 0 }
   0xc   :  { %23 = vsyncpa [#allocation9], 0 }
   0xd   :  { %24 = vsyncpa [#allocation12], 0 }
   0xe   :  { %25 = vsyncpa [#allocation4], 0 }
   0xf   :  { %27 = vsyncpa [#allocation4 + $0x1], 0 }
  0x10   :  { %28 = vsyncpa [#allocation15], 0 }
  0x11   :  { %30 = vsyncpa [#allocation15 + $0x1], 0  ;;  %s3196_s17 = smov 0   ;;  %s3198_s18 = smov 0  }
  0x12   :  { %s3200_s19 = smov 0   ;;  %s3202_s20 = smov 0  }
  0x13 LB: > { %s3123_s21 = smov [#allocation7]   ;;  %s3217_s23 = sadd.s32 4294967295, %s3121_s20   ;;  %s3121_s20 = sphi %s3202_s20, %s3695_s20   ;;  %s3117_s19 = sphi %s3200_s19, %s3694_s19   ;;  %s3113_s18 = sphi %s3198_s18, %s3693_s18   ;;  %s3109_s17 = sphi %s3196_s17, %s3692_s17  }
  0x14   : > { %s325_s22 = sshll.u32 %s3123_s21, 4  ;;  %p2091_p0 = scmp.ge.s32.totalorder %s3121_s20, 1  ;;  %s3222_s22 = int_to_ptr.vmem [resolvable:$true] %s325_s22 }
  0x15   : > { %p3654_p1 = scmp.eq.s32.totalorder %s3217_s23, 0  ;;  %p313_p2 = scmp.lt.s32.totalorder %s3121_s20, 3 }
  0x16   : > { %s3124_s25 = smov [#allocation8]   ;;  %s3125_s28 = smov [#allocation10]  }
  0x17   : > { %p3224_p3 = pnand %p2091_p0, %p313_p2  ;;  %s341_s26 = sshll.u32 %s3124_s25, 4  ;;  %s3237_s26 = int_to_ptr.vmem [resolvable:$true] %s341_s26 }
  0x18   : > { %s357_s29 = sshll.u32 %s3125_s28, 4  ;;  %s3667_s2 = sld [smem:[#allocation24_spill]]  ;;  %s3239_s29 = int_to_ptr.vmem [resolvable:$true] %s357_s29 }
  0x19   : > { %s3665_s24 = scalar_select %p3224_p3, 1, 0 }
  0x1a   : > { %p2729_p5 = pneg %p3224_p3 }
  0x1c   : > { %p3233_p6 = pnand %p2729_p5, %p3654_p1 }
  0x1e   : > { %s2835_s13 = scalar_lea.hbm %s3667_s2, 28672  ;;  %p3249_p8 = pneg %p3233_p6 }
  0x1f   : > { %p2836_p7 = scmp.ne.s32.totalorder %s3667_s2, %s2835_s13  ;;  %p2842_p11 = scmp.lt.u32.totalorder %s2835_s13, %s3667_s2 }
  0x21   : > { %p2838_p9 = pnand %p3249_p8, %p2836_p7 }
  0x23   : > { %p2839_p10 = pneg %p2838_p9 }
  0x25   : > { %p2844_p12 = pnand %p2842_p11, %p2839_p10 }
  0x27   : > { %2847 = shalt.err (!%p2844_p12)
}
  0x28   : > { %s2848_s28 = scalar_lea.vmem %s3222_s22, 28672  ;;  %p2856_p5 = scmp.lt.s32.totalorder %s3222_s22, %s3222_s22 }
  0x29   : > { %p2849_p13 = scmp.ne.s32.totalorder %s3222_s22, %s2848_s28  ;;  %p2857_p4 = scmp.lt.s32.totalorder %s2848_s28, %s2848_s28 }
  0x2b   : > { %p2851_p0 = pnand %p2849_p13, %p3249_p8  ;;  %p2858_p7 = por %p2857_p4, %p2856_p5 }
  0x2d   : > { %p2852_p2 = pneg %p2851_p0 }
  0x2f   : > { %p2859_p9 = pnand %p2858_p7, %p2852_p2 }
  0x31   : > { %2862 = shalt.err (!%p2859_p9)
}
  0x32   : > { %s3126_s30 = smov 256   ;;  %s3127_s12 = smov 16  }
  0x33   : > { %2732 = dma.hbm_to_vmem [thread:$0]  (!%p3233_p6), %s3667_s2, 28672, %s3222_s22, [#allocation6], %s3126_s30, %s3126_s30, %s3127_s12  }
  0x34   : > { %s3669_s4 = sld [smem:[#allocation25_spill]] }
  0x3a   : > { %s2863_s25 = scalar_lea.hbm %s3669_s4, 8192 }
  0x3b   : > { %p2864_p4 = scmp.ne.s32.totalorder %s3669_s4, %s2863_s25  ;;  %p2870_p12 = scmp.lt.u32.totalorder %s2863_s25, %s3669_s4 }
  0x3d   : > { %p2866_p10 = pnand %p2864_p4, %p3249_p8 }
  0x3f   : > { %p2867_p11 = pneg %p2866_p10 }
  0x41   : > { %p2872_p13 = pnand %p2870_p12, %p2867_p11 }
  0x43   : > { %2875 = shalt.err (!%p2872_p13)
}
  0x44   : > { %s2876_s22 = scalar_lea.vmem %s3237_s26, 8192  ;;  %p2884_p7 = scmp.lt.s32.totalorder %s3237_s26, %s3237_s26 }
  0x45   : > { %p2877_p0 = scmp.ne.s32.totalorder %s3237_s26, %s2876_s22  ;;  %p2885_p9 = scmp.lt.s32.totalorder %s2876_s22, %s2876_s22 }
  0x47   : > { %p2879_p2 = pnand %p2877_p0, %p3249_p8  ;;  %p2886_p4 = por %p2885_p9, %p2884_p7 }
  0x49   : > { %p2880_p5 = pneg %p2879_p2 }
  0x4b   : > { %p2887_p10 = pnand %p2886_p4, %p2880_p5 }
  0x4d   : > { %2890 = shalt.err (!%p2887_p10)
}
  0x4e   : > { %2735 = dma.hbm_to_vmem [thread:$0]  (!%p3233_p6), %s3669_s4, 8192, %s3237_s26, [#allocation9], %s3126_s30, %s3126_s30, %s3127_s12  }
  0x4f   : > { %s3670_s6 = sld [smem:[#allocation26_spill]] }
  0x55   : > { %s2891_s14 = scalar_lea.hbm %s3670_s6, 4096 }
  0x56   : > { %p2892_p11 = scmp.ne.s32.totalorder %s3670_s6, %s2891_s14  ;;  %p2898_p0 = scmp.lt.u32.totalorder %s2891_s14, %s3670_s6 }
  0x58   : > { %p2894_p12 = pnand %p2892_p11, %p3249_p8 }
  0x5a   : > { %p2895_p13 = pneg %p2894_p12 }
  0x5c   : > { %p2900_p2 = pnand %p2898_p0, %p2895_p13 }
  0x5e   : > { %2903 = shalt.err (!%p2900_p2)
}
  0x5f   : > { %s2904_s26 = scalar_lea.vmem %s3239_s29, 4096  ;;  %p2912_p4 = scmp.lt.s32.totalorder %s3239_s29, %s3239_s29 }
  0x60   : > { %p2905_p5 = scmp.ne.s32.totalorder %s3239_s29, %s2904_s26  ;;  %p2913_p10 = scmp.lt.s32.totalorder %s2904_s26, %s2904_s26 }
  0x62   : > { %p2907_p7 = pnand %p2905_p5, %p3249_p8  ;;  %p2914_p11 = por %p2913_p10, %p2912_p4 }
  0x64   : > { %p2908_p9 = pneg %p2907_p7 }
  0x66   : > { %p2915_p12 = pnand %p2914_p11, %p2908_p9 }
  0x68   : > { %2918 = shalt.err (!%p2915_p12)
}
  0x69   : > { %2738 = dma.hbm_to_vmem [thread:$0]  (!%p3233_p6), %s3670_s6, 4096, %s3239_s29, [#allocation9], %s3126_s30, %s3126_s30, %s3127_s12  }
  0x6a   : > { %s3128_s10 = smov [#allocation11]   ;;  %s2919_s15 = scalar_lea.hbm %s3648_s8, 28672 }
  0x6b   : > { %s373_s11 = sshll.u32 %s3128_s10, 4  ;;  %p2920_p13 = scmp.ne.s32.totalorder %s3648_s8, %s2919_s15  ;;  %s374_s11 = int_to_ptr.vmem [resolvable:$true] %s373_s11 }
  0x6c   : > { %p2926_p5 = scmp.lt.u32.totalorder %s2919_s15, %s3648_s8 }
  0x6d   : > { %p2922_p0 = pnand %p2920_p13, %p3249_p8 }
  0x6f   : > { %p2923_p2 = pneg %p2922_p0 }
  0x71   : > { %p2928_p7 = pnand %p2926_p5, %p2923_p2 }
  0x73   : > { %2931 = shalt.err (!%p2928_p7)
}
  0x74   : > { %s2932_s29 = scalar_lea.vmem %s374_s11, 28672  ;;  %p2940_p11 = scmp.lt.s32.totalorder %s374_s11, %s374_s11 }
  0x75   : > { %p2933_p9 = scmp.ne.s32.totalorder %s374_s11, %s2932_s29  ;;  %p2941_p12 = scmp.lt.s32.totalorder %s2932_s29, %s2932_s29 }
  0x77   : > { %p2935_p4 = pnand %p2933_p9, %p3249_p8  ;;  %p2942_p1 = por %p2941_p12, %p2940_p11 }
  0x79   : > { %p2936_p10 = pneg %p2935_p4 }
  0x7b   : > { %p2943_p3 = pnand %p2942_p1, %p2936_p10 }
  0x7d   : > { %2946 = shalt.err (!%p2943_p3)
}
  0x7e   : > { %s3129_s30 = smov 896   ;;  %s3130_s16 = smov 56  }
  0x7f   : > { %2741 = dma.hbm_to_vmem [thread:$0]  (!%p3233_p6), %s3648_s8, 28672, %s374_s11, [#allocation12], %s3129_s30, %s3129_s30, %s3130_s16  }
  0x80   : > { %s2090_s9 = sadd.s32 4294967294, %s3121_s20   ;;  %s3345_s10 = sadd.s32 1, %s3121_s20  }
  0x81   : > { %s40_s13 = ssub.s32 %s3121_s20, %s3345_s10  ;;  %s43_s14 = sadd.s32 1, %s3117_s19 }
  0x82   : > { %p41_p1 = scmp.eq.s32.totalorder %s40_s13, 0  ;;  %p50_p3 = scmp.ne.s32.totalorder %s3117_s19, %s3113_s18 }
  0x83   : > { %p51_p8 = scmp.eq.s32.totalorder %s3121_s20, 0  ;;  %p56_p13 = scmp.ne.s32.totalorder %s3113_s18, %s3109_s17 }
  0x84   : > { %s3356_s15 = scalar_select %p41_p1, %s3117_s19, %s43_s14  }
  0x85   : > { %p52_p0 = por %p51_p8, %p50_p3  ;;  %p3671_p2 = scmp.eq.s32.totalorder %s3217_s23, 0 }
  0x86   : > { %p274_p6 = scmp.eq.s32.totalorder %s3217_s23, 1  ;;  %p280_p7 = scmp.eq.s32.totalorder %s2090_s9, 1 }
  0x87   : > { %p3360_p5 = por %p3671_p2, %p56_p13  ;;  %p2760_p9 = scmp.lt.s32.totalorder %s3121_s20, 2 }
  0x88   : > { %s3367_s11 = sand.u32 1, %s3117_s19   ;;  %p3369_p4 = por %p274_p6, %p50_p3 }
  0x89   : > { %s3672_s27 = scalar_select %p3360_p5, 1, 0 }
  0x8a   : > { %s3673_s21 = scalar_select %p3369_p4, 1, 0 }
  0x8b   : > { %p3373_p10 = por %p280_p7, %p56_p13  ;;  %s2701_s28 = smul.u32 56, %s3367_s11 }
  0x8c   : > { %s2702_s26 = smul.u32 896, %s3121_s20  ;;  %p3379_p11 = pnand %p2760_p9, %p52_p0 }
  0x8d   : > { %s3674_s25 = scalar_select %p3373_p10, 1, 0 }
  0x8e   : > { %s3676_s0 = sld [smem:[#allocation23_spill]]  ;;  %s394_s9 = scalar_lea.vmem [#allocation2], %s2701_s28 }
  0x8f   : > { %s402_s13 = sshll.u32 %s394_s9, 4  ;;  %s391_s14 = scalar_lea.sflag [#allocation3], %s3367_s11  ;;  %s3389_s13 = int_to_ptr.vmem [resolvable:$true] %s402_s13 }
  0x90   : > { %p2949_p1 = pneg %p3379_p11 }
  0x94   : > { %s3387_s22 = scalar_lea.hbm %s3676_s0, %s2702_s26  ;;  %s2952_s12 = scalar_lea.hbm %s3676_s0, 1792 }
  0x95   : > { %s2947_s2 = scalar_lea.hbm %s3387_s22, 896  ;;  %p2953_p13 = scmp.lt.u32.totalorder %s3387_s22, %s3676_s0 }
  0x96   : > { %p2948_p12 = scmp.ne.s32.totalorder %s3387_s22, %s2947_s2  ;;  %p2954_p0 = scmp.lt.u32.totalorder %s2952_s12, %s2947_s2 }
  0x97   : > { %p2956_p6 = scmp.lt.u32.totalorder %s2947_s2, %s3387_s22 }
  0x98   : > { %p2950_p3 = pnand %p2949_p1, %p2948_p12  ;;  %p2955_p2 = por %p2954_p0, %p2953_p13 }
  0x9a   : > { %p2951_p8 = pneg %p2950_p3  ;;  %p2957_p7 = por %p2956_p6, %p2955_p2 }
  0x9c   : > { %p2958_p9 = pnand %p2957_p7, %p2951_p8 }
  0x9e   : > { %2961 = shalt.err (!%p2958_p9)
}
  0x9f   : > { %s2962_s28 = scalar_lea.vmem %s3389_s13, 896  ;;  %s3131_s9 = smov [#allocation2]  }
  0xa0   : > { %p2963_p12 = scmp.ne.s32.totalorder %s3389_s13, %s2962_s28  ;;  %s2967_s16 = sshll.u32 %s3131_s9, 4  ;;  %s2968_s16 = int_to_ptr.vmem [resolvable:$false] %s2967_s16 }
  0xa1   : > { %s2969_s4 = scalar_lea.vmem %s2968_s16, 1792  ;;  %p2970_p4 = scmp.lt.s32.totalorder %s3389_s13, %s2968_s16 }
  0xa2   : > { %p2965_p3 = pnand %p2963_p12, %p2949_p1  ;;  %p2971_p13 = scmp.lt.s32.totalorder %s2969_s4, %s2962_s28 }
  0xa4   : > { %p2966_p10 = pneg %p2965_p3  ;;  %p2972_p0 = por %p2971_p13, %p2970_p4 }
  0xa6   : > { %p2973_p2 = pnand %p2972_p0, %p2966_p10 }
  0xa8   : > { %2976 = shalt.err (!%p2973_p2)
}
  0xa9   : > { %2745 = dma.hbm_to_vmem [thread:$0]  (!%p3379_p11), %s3387_s22, 896, %s3389_s13, %s391_s14  }
  0xaa   : > { %s2098_s2 = sshll.u32 %s3367_s11, 3  ;;  %s2099_s30 = sshll.u32 %s3121_s20, 7 }
  0xab   : > { %s3422_s9 = scalar_lea.hbm %s3641_s1, %s2099_s30  ;;  %s413_s28 = scalar_lea.vmem [#allocation5], %s2098_s2 }
  0xac   : > { %s420_s16 = sshll.u32 %s413_s28, 4  ;;  %s3677_s4 = sand.u32 1, %s3121_s20   ;;  %s421_s16 = int_to_ptr.vmem [resolvable:$true] %s420_s16 }
  0xad   : > { %s410_s0 = scalar_lea.sflag [#allocation6], %s3677_s4  ;;  %s2977_s6 = scalar_lea.hbm %s3422_s9, 128 }
  0xae   : > { %p2978_p4 = scmp.ne.s32.totalorder %s3422_s9, %s2977_s6  ;;  %s2982_s13 = scalar_lea.hbm %s3641_s1, 256 }
  0xaf   : > { %p2983_p6 = scmp.lt.u32.totalorder %s3422_s9, %s3641_s1  ;;  %p2984_p7 = scmp.lt.u32.totalorder %s2982_s13, %s2977_s6 }
  0xb0   : > { %p2980_p10 = pnand %p2978_p4, %p2949_p1  ;;  %p2986_p12 = scmp.lt.u32.totalorder %s2977_s6, %s3422_s9 }
  0xb1   : > { %p2985_p9 = por %p2984_p7, %p2983_p6 }
  0xb2   : > { %p2981_p8 = pneg %p2980_p10 }
  0xb3   : > { %p2987_p3 = por %p2986_p12, %p2985_p9 }
  0xb5   : > { %p2988_p13 = pnand %p2987_p3, %p2981_p8 }
  0xb7   : > { %2991 = shalt.err (!%p2988_p13)
}
  0xb8   : > { %s2992_s2 = scalar_lea.vmem %s421_s16, 128  ;;  %s3132_s26 = smov [#allocation5]  }
  0xb9   : > { %p2993_p0 = scmp.ne.s32.totalorder %s421_s16, %s2992_s2  ;;  %s2997_s12 = sshll.u32 %s3132_s26, 4  ;;  %s2998_s12 = int_to_ptr.vmem [resolvable:$false] %s2997_s12 }
  0xba   : > { %s2999_s28 = scalar_lea.vmem %s2998_s12, 256  ;;  %p3000_p10 = scmp.lt.s32.totalorder %s421_s16, %s2998_s12 }
  0xbb   : > { %p2995_p2 = pnand %p2993_p0, %p2949_p1  ;;  %p3001_p5 = scmp.lt.s32.totalorder %s2999_s28, %s2992_s2 }
  0xbd   : > { %p2996_p4 = pneg %p2995_p2  ;;  %p3002_p6 = por %p3001_p5, %p3000_p10 }
  0xbf   : > { %p3003_p7 = pnand %p3002_p6, %p2996_p4 }
  0xc1   : > { %3006 = shalt.err (!%p3003_p7)
}
  0xc2   : > { %2748 = dma.hbm_to_vmem [thread:$0]  (!%p3379_p11), %s3422_s9, 128, %s421_s16, %s410_s0  }
  0xc3   : > { %p3678_p8 = scmp.ne.s32.totalorder %s3665_s24, 0 }
  0xc4   : > { %s3448_s6 = sand.u32 (!%p3678_p8), 1, %s3113_s18   ;;  %p3679_p5 = scmp.ne.s32.totalorder (!%p3678_p8), %s3672_s27, 0 }
  0xc5   : > { %429 = sbr.rel (%p3678_p8) target bundleno = 1455 (0x5af), region = 60  ;;  %s432_s11 = scalar_lea.sflag (!%p3678_p8), [#allocation3], %s3448_s6 }
  0xc6   : > { %s2703_s4 = smul.u32 (!%p3678_p8), 56, %s3448_s6 }
  0xc8   : > { %s3454_s22 = scalar_lea.vmem (!%p3678_p8), [#allocation2], %s2703_s4 }
  0xcc   : > { %3080 = dma.done.wait (%p3679_p5), %s432_s11, 896  }
  0xcd   : > { %3082 = vsyncadd (%p3679_p5), %s432_s11, 4294966400  ;;  %s440_s0 = sand.u32 1, %s3217_s23   ;;  %s2101_s24 = sshll.u32 %s3448_s6, 3 }
  0xce   : > { %s441_s29 = scalar_lea.sflag [#allocation6], %s440_s0  ;;  %s3462_s9 = scalar_lea.vmem [#allocation5], %s2101_s24 }
  0xcf   : > { %3084 = dma.done.wait (%p3679_p5), %s441_s29, 128  }
  0xd0   : > { %3086 = vsyncadd (%p3679_p5), %s441_s29, 4294967168  ;;  %p3680_p11 = scmp.eq.s32.totalorder %s3217_s23, 0 }
  0xd2   : > { %3088 = dma.done.wait (%p3680_p11), [#allocation6], 28672   ;;  %p3681_p1 = pmov %p3680_p11 }
  0xd4   : > { %3090 = vsyncadd (%p3681_p1), [#allocation6], 4294938624  ;;  %p3682_p9 = pmov %p3681_p1 }
  0xd5   : > { %p3683_p12 = pmov %p3681_p1 }
  0xd6   : > { %3092 = dma.done.wait (%p3682_p9), [#allocation9], 12288  }
  0xd7   : > { %3094 = vsyncadd (%p3683_p12), [#allocation9], 4294955008  ;;  %p3684_p3 = pmov %p3681_p1 }
  0xd8   : > { %p3685_p13 = pmov %p3681_p1 }
  0xd9   : > { %3096 = dma.done.wait (%p3684_p3), [#allocation12], 28672  }
  0xda   : > { %3098 = vsyncadd (%p3685_p13), [#allocation12], 4294938624  ;;  %v517_v0 = vld [vmem:[#allocation7 + $0x8] sm:$0xff]  ;;  %v519_v1 = vld [vmem:[#allocation7 + $0x18] sm:$0xff]  ;;  %s2106_s30 = sshll.u32 %s3448_s6, 4  ;;  %s2113_s0 = sshll.u32 %s3217_s23, 8 }
  0xdb   : > { %v516_v2 = vld [vmem:[#allocation7] sm:$0xff]  ;;  %v2149_v3 = vpack.c.bf16 %v519_v1, %v517_v0  ;;  %v518_v4 = vld [vmem:[#allocation7 + $0x10] sm:$0xff]  ;;  %v521_v5 = vld [vmem:[#allocation7 + $0x28] sm:$0xff]  ;;  %s3509_s2 = scalar_lea.vmem [#allocation14], %s2106_s30  ;;  %s1899_s13 = scalar_lea.sflag [#allocation15], %s3448_s6 }
  0xdc   : > { %v523_v6 = vld [vmem:[#allocation7 + $0x38] sm:$0xff]  ;;  %v2151_v7 = vpack.c.bf16 %v518_v4, %v516_v2  ;;  %v520_v9 = vld [vmem:[#allocation7 + $0x20] sm:$0xff]  ;;  %v522_v10 = vld [vmem:[#allocation7 + $0x30] sm:$0xff]  ;;  %s1927_s16 = sshll.u32 %s3509_s2, 4  ;;  %p3688_p2 = scmp.ne.s32.totalorder %s3673_s21, 0  ;;  %s3550_s16 = int_to_ptr.vmem [resolvable:$true] %s1927_s16 }
  0xdd   : > { %v2153_v8 = vpack.c.bf16 %v523_v6, %v521_v5  ;;  %v525_v11 = vld [vmem:[#allocation7 + $0x48] sm:$0xff]  ;;  %2150 = vmatprep.subr.bf16.mxu0 %v2149_v3  ;;  %v527_v12 = vld [vmem:[#allocation7 + $0x58] sm:$0xff]  ;;  %v2155_v13 = vpack.c.bf16 %v522_v10, %v520_v9  ;;  %v524_v15 = vld [vmem:[#allocation7 + $0x40] sm:$0xff]  ;;  %s3007_s14 = scalar_lea.vmem %s3550_s16, 256  ;;  %s3134_s30 = smov [#allocation14]  }
  0xde   : > { %2152 = vmatpush1.bf16.msra.mxu0 %v2151_v7  ;;  %v2157_v14 = vpack.c.bf16 %v527_v12, %v525_v11  ;;  %v526_v16 = vld [vmem:[#allocation7 + $0x50] sm:$0xff]  ;;  %v529_v17 = vld [vmem:[#allocation7 + $0x68] sm:$0xff]  ;;  %v531_v18 = vld [vmem:[#allocation7 + $0x78] sm:$0xff]  ;;  %p3008_p0 = scmp.ne.s32.totalorder %s3550_s16, %s3007_s14  ;;  %s3011_s26 = sshll.u32 %s3134_s30, 4  ;;  %s3012_s26 = int_to_ptr.vmem [resolvable:$false] %s3011_s26 }
  0xdf   : > { %2154 = vmatprep.subr.bf16.mxu0 %v2153_v8  ;;  %v2159_v19 = vpack.c.bf16 %v526_v16, %v524_v15  ;;  %v2161_v20 = vpack.c.bf16 %v531_v18, %v529_v17  ;;  %v528_v21 = vld [vmem:[#allocation7 + $0x60] sm:$0xff]  ;;  %v530_v22 = vld [vmem:[#allocation7 + $0x70] sm:$0xff]  ;;  %v533_v23 = vld [vmem:[#allocation7 + $0x88] sm:$0xff]  ;;  %s3013_s12 = scalar_lea.vmem %s3012_s26, 512  ;;  %p3014_p6 = scmp.lt.s32.totalorder %s3550_s16, %s3012_s26 }
  0xe0   : > { %v535_v24 = vld [vmem:[#allocation7 + $0x98] sm:$0xff]  ;;  %v2163_v25 = vpack.c.bf16 %v530_v22, %v528_v21  ;;  %v532_v27 = vld [vmem:[#allocation7 + $0x80] sm:$0xff]  ;;  %v534_v28 = vld [vmem:[#allocation7 + $0x90] sm:$0xff]  ;;  %p3009_p4 = pnand %p3008_p0, %p3688_p2  ;;  %p3015_p7 = scmp.lt.s32.totalorder %s3013_s12, %s3007_s14 }
  0xe1   : > { %v2165_v26 = vpack.c.bf16 %v535_v24, %v533_v23  ;;  %v537_v29 = vld [vmem:[#allocation7 + $0xa8] sm:$0xff]  ;;  %v539_v30 = vld [vmem:[#allocation7 + $0xb8] sm:$0xff]  ;;  %v2167_v31 = vpack.c.bf16 %v534_v28, %v532_v27  ;;  %v536_v33 = vld [vmem:[#allocation7 + $0xa0] sm:$0xff] }
  0xe2   : > { %2156 = vmatpush1.bf16.msra.mxu0 %v2155_v13  ;;  %v2169_v32 = vpack.c.bf16 %v539_v30, %v537_v29  ;;  %v538_v34 = vld [vmem:[#allocation7 + $0xb0] sm:$0xff]  ;;  %v541_v35 = vld [vmem:[#allocation7 + $0xc8] sm:$0xff]  ;;  %v543_v36 = vld [vmem:[#allocation7 + $0xd8] sm:$0xff]  ;;  %p3010_p10 = pneg %p3009_p4  ;;  %p3016_p8 = por %p3015_p7, %p3014_p6 }
  0xe3   : > { %2158 = vmatprep.subr.bf16.mxu0 %v2157_v14  ;;  %v2171_v37 = vpack.c.bf16 %v538_v34, %v536_v33  ;;  %v2173_v38 = vpack.c.bf16 %v543_v36, %v541_v35  ;;  %v540_v39 = vld [vmem:[#allocation7 + $0xc0] sm:$0xff]  ;;  %v542_v40 = vld [vmem:[#allocation7 + $0xd0] sm:$0xff]  ;;  %v545_v42 = vld [vmem:[#allocation7 + $0xe8] sm:$0xff] }
  0xe4   : > { %v510_v41 = vld [vmem:[%s3454_s22 + $0x8] sm:$0xff]  ;;  %v547_v43 = vld [vmem:[#allocation7 + $0xf8] sm:$0xff]  ;;  %v2175_v44 = vpack.c.bf16 %v542_v40, %v540_v39  ;;  %v546_v47 = vld [vmem:[#allocation7 + $0xf0] sm:$0xff]  ;;  %p3017_p5 = pnand %p3016_p8, %p3010_p10 }
  0xe5   : > { %816 = vmatprep.mubr.f32.mxu0 %v510_v41  ;;  %v2177_v45 = vpack.c.bf16 %v547_v43, %v545_v42  ;;  %v544_v46 = vld [vmem:[#allocation7 + $0xe0] sm:$0xff]  ;;  %v549_v48 = vld [vmem:[#allocation7 + $0x108] sm:$0xff]  ;;  %v551_v49 = vld [vmem:[#allocation7 + $0x118] sm:$0xff] }
  0xe6   : > { %2160 = vmatpush1.bf16.msra.mxu0 %v2159_v19  ;;  %v2179_v50 = vpack.c.bf16 %v546_v47, %v544_v46  ;;  %v2181_v51 = vpack.c.bf16 %v551_v49, %v549_v48  ;;  %v548_v52 = vld [vmem:[#allocation7 + $0x100] sm:$0xff]  ;;  %v550_v53 = vld [vmem:[#allocation7 + $0x110] sm:$0xff]  ;;  %v553_v54 = vld [vmem:[#allocation7 + $0x128] sm:$0xff] }
  0xe7   : > { %2162 = vmatprep.subr.bf16.mxu0 %v2161_v20  ;;  %v555_v55 = vld [vmem:[#allocation7 + $0x138] sm:$0xff]  ;;  %v2183_v56 = vpack.c.bf16 %v550_v53, %v548_v52  ;;  %v552_v58 = vld [vmem:[#allocation7 + $0x120] sm:$0xff]  ;;  %v554_v59 = vld [vmem:[#allocation7 + $0x130] sm:$0xff] }
  0xe8   : > { %v2185_v57 = vpack.c.bf16 %v555_v55, %v553_v54  ;;  %v557_v60 = vld [vmem:[#allocation7 + $0x148] sm:$0xff]  ;;  %v559_v61 = vld [vmem:[#allocation7 + $0x158] sm:$0xff]  ;;  %v2187_v62 = vpack.c.bf16 %v554_v59, %v552_v58  ;;  %v556_v0 = vld [vmem:[#allocation7 + $0x140] sm:$0xff] }
  0xe9   : > { %v2189_v63 = vpack.c.bf16 %v559_v61, %v557_v60  ;;  %v558_v1 = vld [vmem:[#allocation7 + $0x150] sm:$0xff]  ;;  %v561_v2 = vld [vmem:[#allocation7 + $0x168] sm:$0xff]  ;;  %v563_v3 = vld [vmem:[#allocation7 + $0x178] sm:$0xff] }
  0xea   : > { %2164 = vmatpush1.bf16.msra.mxu0 %v2163_v25  ;;  %v2191_v4 = vpack.c.bf16 %v558_v1, %v556_v0  ;;  %v2193_v5 = vpack.c.bf16 %v563_v3, %v561_v2  ;;  %v560_v6 = vld [vmem:[#allocation7 + $0x160] sm:$0xff]  ;;  %v562_v7 = vld [vmem:[#allocation7 + $0x170] sm:$0xff]  ;;  %v565_v8 = vld [vmem:[#allocation7 + $0x188] sm:$0xff] }
  0xeb   : > { %2166 = vmatprep.subr.bf16.mxu0 %v2165_v26  ;;  %v567_v9 = vld [vmem:[#allocation7 + $0x198] sm:$0xff]  ;;  %v2195_v10 = vpack.c.bf16 %v562_v7, %v560_v6  ;;  %v564_v12 = vld [vmem:[#allocation7 + $0x180] sm:$0xff]  ;;  %v566_v13 = vld [vmem:[#allocation7 + $0x190] sm:$0xff] }
  0xec   : > { %v2197_v11 = vpack.c.bf16 %v567_v9, %v565_v8  ;;  %v569_v14 = vld [vmem:[#allocation7 + $0x1a8] sm:$0xff]  ;;  %v571_v15 = vld [vmem:[#allocation7 + $0x1b8] sm:$0xff]  ;;  %v2199_v16 = vpack.c.bf16 %v566_v13, %v564_v12  ;;  %v568_v18 = vld [vmem:[#allocation7 + $0x1a0] sm:$0xff] }
  0xed   : > { %v2201_v17 = vpack.c.bf16 %v571_v15, %v569_v14  ;;  %v570_v19 = vld [vmem:[#allocation7 + $0x1b0] sm:$0xff]  ;;  %v573_v20 = vld [vmem:[#allocation7 + $0x1c8] sm:$0xff]  ;;  %v575_v21 = vld [vmem:[#allocation7 + $0x1d8] sm:$0xff] }
  0xee   : > { %2168 = vmatpush1.bf16.msra.mxu0 %v2167_v31  ;;  %v2203_v22 = vpack.c.bf16 %v570_v19, %v568_v18  ;;  %v2205_v23 = vpack.c.bf16 %v575_v21, %v573_v20  ;;  %v572_v24 = vld [vmem:[#allocation7 + $0x1c0] sm:$0xff]  ;;  %v574_v25 = vld [vmem:[#allocation7 + $0x1d0] sm:$0xff]  ;;  %v577_v26 = vld [vmem:[#allocation7 + $0x1e8] sm:$0xff] }
  0xef   : > { %2170 = vmatprep.subr.bf16.mxu0 %v2169_v32  ;;  %v579_v27 = vld [vmem:[#allocation7 + $0x1f8] sm:$0xff]  ;;  %v2207_v28 = vpack.c.bf16 %v574_v25, %v572_v24  ;;  %v576_v30 = vld [vmem:[#allocation7 + $0x1e0] sm:$0xff]  ;;  %v578_v31 = vld [vmem:[#allocation7 + $0x1f0] sm:$0xff] }
  0xf0   : > { %v2209_v29 = vpack.c.bf16 %v579_v27, %v577_v26  ;;  %v581_v32 = vld [vmem:[#allocation7 + $0x208] sm:$0xff]  ;;  %v583_v33 = vld [vmem:[#allocation7 + $0x218] sm:$0xff]  ;;  %v2211_v34 = vpack.c.bf16 %v578_v31, %v576_v30  ;;  %v580_v36 = vld [vmem:[#allocation7 + $0x200] sm:$0xff] }
  0xf1   : > { %v2213_v35 = vpack.c.bf16 %v583_v33, %v581_v32  ;;  %v587_v39 = vld [vmem:[#allocation7 + $0x238] sm:$0xff]  ;;  %v584_v43 = vld [vmem:[#allocation7 + $0x220] sm:$0xff]  ;;  %v589_v46 = vld [vmem:[#allocation7 + $0x248] sm:$0xff] }
  0xf2   : > { %2172 = vmatpush1.bf16.msra.mxu0 %v2171_v37  ;;  %v582_v37 = vld [vmem:[#allocation7 + $0x210] sm:$0xff]  ;;  %v509_v40 = vld [vmem:[%s3454_s22] sm:$0xff]  ;;  %v593_v52 = vld [vmem:[#allocation7 + $0x268] sm:$0xff] }
  0xf3   : > { %2174 = vmatprep.subr.bf16.mxu0 %v2173_v38  ;;  %v585_v38 = vld [vmem:[#allocation7 + $0x228] sm:$0xff]  ;;  %v2215_v41 = vpack.c.bf16 %v582_v37, %v580_v36  ;;  %v591_v47 = vld [vmem:[#allocation7 + $0x258] sm:$0xff]  ;;  %v620_v32 = vld [vmem:[#allocation7 + $0x340] sm:$0xff] }
  0xf4   : > { %v2217_v42 = vpack.c.bf16 %v587_v39, %v585_v38  ;;  %v2221_v49 = vpack.c.bf16 %v591_v47, %v589_v46  ;;  %v595_v53 = vld [vmem:[#allocation7 + $0x278] sm:$0xff]  ;;  %v597_v58 = vld [vmem:[#allocation7 + $0x288] sm:$0xff]  ;;  %v622_v33 = vld [vmem:[#allocation7 + $0x350] sm:$0xff] }
  0xf5   : > { %v2225_v55 = vpack.c.bf16 %v595_v53, %v593_v52  ;;  %v599_v59 = vld [vmem:[#allocation7 + $0x298] sm:$0xff]  ;;  %v601_v0 = vld [vmem:[#allocation7 + $0x2a8] sm:$0xff]  ;;  %v1038_v36 = vld [vmem:[#allocation8] sm:$0xff]  ;;  %v2255_v52 = vpack.c.bf16 %v622_v33, %v620_v32 }
  0xf6   : > { %2176 = vmatpush1.bf16.msra.mxu0 %v2175_v44  ;;  %v586_v44 = vld [vmem:[#allocation7 + $0x230] sm:$0xff]  ;;  %v2229_v61 = vpack.c.bf16 %v599_v59, %v597_v58  ;;  %v603_v1 = vld [vmem:[#allocation7 + $0x2b8] sm:$0xff]  ;;  %v605_v6 = vld [vmem:[#allocation7 + $0x2c8] sm:$0xff] }
  0xf7   : > { %2178 = vmatprep.subr.bf16.mxu0 %v2177_v45  ;;  %v512_v45 = vld [vmem:[%s3454_s22 + $0x18] sm:$0xff]  ;;  %v2219_v48 = vpack.c.bf16 %v586_v44, %v584_v43  ;;  %v2233_v3 = vpack.c.bf16 %v603_v1, %v601_v0  ;;  %v609_v12 = vld [vmem:[#allocation7 + $0x2e8] sm:$0xff]  ;;  %v624_v53 = vld [vmem:[#allocation7 + $0x360] sm:$0xff] }
  0xf8   : > { %v607_v7 = vld [vmem:[#allocation7 + $0x2d8] sm:$0xff]  ;;  %v613_v18 = vld [vmem:[#allocation7 + $0x308] sm:$0xff]  ;;  %v1040_v39 = vld [vmem:[#allocation8 + $0x10] sm:$0xff] }
  0xf9   : > { %v2237_v9 = vpack.c.bf16 %v607_v7, %v605_v6  ;;  %v611_v13 = vld [vmem:[#allocation7 + $0x2f8] sm:$0xff]  ;;  %v617_v24 = vld [vmem:[#allocation7 + $0x328] sm:$0xff]  ;;  %v2375_v43 = vpack.c.bf16 %v1040_v39, %v1038_v36  ;;  %v1044_v46 = vld [vmem:[#allocation8 + $0x30] sm:$0xff] }
  0xfa   : > { %2180 = vmatpush1.bf16.msra.mxu0 %v2179_v50  ;;  %v588_v50 = vld [vmem:[#allocation7 + $0x240] sm:$0xff]  ;;  %v2241_v15 = vpack.c.bf16 %v611_v13, %v609_v12  ;;  %v615_v19 = vld [vmem:[#allocation7 + $0x318] sm:$0xff]  ;;  %v621_v30 = vld [vmem:[#allocation7 + $0x348] sm:$0xff] }
  0xfb   : > { %2182 = vmatprep.subr.bf16.mxu0 %v2181_v51  ;;  %v590_v51 = vld [vmem:[#allocation7 + $0x250] sm:$0xff]  ;;  %v2245_v21 = vpack.c.bf16 %v615_v19, %v613_v18  ;;  %v619_v25 = vld [vmem:[#allocation7 + $0x338] sm:$0xff]  ;;  %v1047_v47 = vld [vmem:[#allocation8 + $0x48] sm:$0xff] }
  0xfc   : > { %v2223_v54 = vpack.c.bf16 %v590_v51, %v588_v50  ;;  %v2249_v27 = vpack.c.bf16 %v619_v25, %v617_v24  ;;  %v623_v31 = vld [vmem:[#allocation7 + $0x358] sm:$0xff]  ;;  %v626_v58 = vld [vmem:[#allocation7 + $0x370] sm:$0xff]  ;;  %v1051_v59 = vld [vmem:[#allocation8 + $0x68] sm:$0xff] }
  0xfd   : > { %v1049_v50 = vld [vmem:[#allocation8 + $0x58] sm:$0xff]  ;;  %v2259_v0 = vpack.c.bf16 %v626_v58, %v624_v53  ;;  %v628_v1 = vld [vmem:[#allocation7 + $0x380] sm:$0xff]  ;;  %v630_v6 = vld [vmem:[#allocation7 + $0x390] sm:$0xff] }
  0xfe   : > { %2184 = vmatpush1.bf16.msra.mxu0 %v2183_v56  ;;  %v592_v56 = vld [vmem:[#allocation7 + $0x260] sm:$0xff]  ;;  %v1055_v7 = vld [vmem:[#allocation8 + $0x88] sm:$0xff]  ;;  %v2263_v12 = vpack.c.bf16 %v630_v6, %v628_v1  ;;  %v634_v18 = vld [vmem:[#allocation7 + $0x3b0] sm:$0xff] }
  0xff   : > { %2186 = vmatprep.subr.bf16.mxu0 %v2185_v57  ;;  %v594_v57 = vld [vmem:[#allocation7 + $0x270] sm:$0xff]  ;;  %v632_v13 = vld [vmem:[#allocation7 + $0x3a0] sm:$0xff]  ;;  %v1059_v19 = vld [vmem:[#allocation8 + $0xa8] sm:$0xff] }
 0x100   : > { %v2227_v60 = vpack.c.bf16 %v594_v57, %v592_v56  ;;  %v1048_v56 = vld [vmem:[#allocation8 + $0x50] sm:$0xff]  ;;  %v2267_v24 = vpack.c.bf16 %v634_v18, %v632_v13  ;;  %v636_v25 = vld [vmem:[#allocation7 + $0x3c0] sm:$0xff]  ;;  %v1065_v32 = vld [vmem:[#allocation8 + $0xd8] sm:$0xff] }
 0x101   : > { %v641_v33 = vld [vmem:[#allocation7 + $0x3e8] sm:$0xff]  ;;  %v1062_v39 = vld [vmem:[#allocation8 + $0xc0] sm:$0xff]  ;;  %v1073_v58 = vld [vmem:[#allocation8 + $0x118] sm:$0xff] }
 0x102   : > { %2188 = vmatpush1.bf16.msra.mxu0 %v2187_v62  ;;  %v596_v62 = vld [vmem:[#allocation7 + $0x280] sm:$0xff]  ;;  %v1072_v1 = vld [vmem:[#allocation8 + $0x110] sm:$0xff]  ;;  %v1077_v6 = vld [vmem:[#allocation8 + $0x138] sm:$0xff] }
 0x103   : > { %2190 = vmatprep.subr.bf16.mxu0 %v2189_v63  ;;  %v598_v63 = vld [vmem:[#allocation7 + $0x290] sm:$0xff]  ;;  %v644_v53 = vld [vmem:[#allocation7 + $0x400] sm:$0xff]  ;;  %v1081_v18 = vld [vmem:[#allocation8 + $0x158] sm:$0xff] }
 0x104   : > { %v2231_v2 = vpack.c.bf16 %v598_v63, %v596_v62  ;;  %v631_v62 = vld [vmem:[#allocation7 + $0x398] sm:$0xff]  ;;  %v1074_v13 = vld [vmem:[#allocation8 + $0x120] sm:$0xff] }
 0x106   : > { %2192 = vmatpush1.bf16.msra.mxu0 %v2191_v4  ;;  %v600_v4 = vld [vmem:[#allocation7 + $0x2a0] sm:$0xff] }
 0x107   : > { %2194 = vmatprep.subr.bf16.mxu0 %v2193_v5  ;;  %v602_v5 = vld [vmem:[#allocation7 + $0x2b0] sm:$0xff] }
 0x108   : > { %v2235_v8 = vpack.c.bf16 %v602_v5, %v600_v4  ;;  %v1052_v4 = vld [vmem:[#allocation8 + $0x70] sm:$0xff] }
 0x10a   : > { %2196 = vmatpush1.bf16.msra.mxu0 %v2195_v10  ;;  %v604_v10 = vld [vmem:[#allocation7 + $0x2c0] sm:$0xff] }
 0x10b   : > { %2198 = vmatprep.subr.bf16.mxu0 %v2197_v11  ;;  %v606_v11 = vld [vmem:[#allocation7 + $0x2d0] sm:$0xff] }
 0x10c   : > { %v2239_v14 = vpack.c.bf16 %v606_v11, %v604_v10  ;;  %v635_v10 = vld [vmem:[#allocation7 + $0x3b8] sm:$0xff] }
 0x10e   : > { %2200 = vmatpush1.bf16.msra.mxu0 %v2199_v16  ;;  %v608_v16 = vld [vmem:[#allocation7 + $0x2e0] sm:$0xff] }
 0x10f   : > { %2202 = vmatprep.subr.bf16.mxu0 %v2201_v17  ;;  %v610_v17 = vld [vmem:[#allocation7 + $0x2f0] sm:$0xff] }
 0x110   : > { %v2243_v20 = vpack.c.bf16 %v610_v17, %v608_v16  ;;  %v1056_v16 = vld [vmem:[#allocation8 + $0x90] sm:$0xff] }
 0x112   : > { %2204 = vmatpush1.bf16.msra.mxu0 %v2203_v22  ;;  %v612_v22 = vld [vmem:[#allocation7 + $0x300] sm:$0xff] }
 0x113   : > { %2206 = vmatprep.subr.bf16.mxu0 %v2205_v23  ;;  %v614_v23 = vld [vmem:[#allocation7 + $0x310] sm:$0xff] }
 0x114   : > { %v2247_v26 = vpack.c.bf16 %v614_v23, %v612_v22  ;;  %v639_v22 = vld [vmem:[#allocation7 + $0x3d8] sm:$0xff] }
 0x116   : > { %2208 = vmatpush1.bf16.msra.mxu0 %v2207_v28  ;;  %v616_v28 = vld [vmem:[#allocation7 + $0x320] sm:$0xff] }
 0x117   : > { %2210 = vmatprep.subr.bf16.mxu0 %v2209_v29  ;;  %v618_v29 = vld [vmem:[#allocation7 + $0x330] sm:$0xff] }
 0x118   : > { %v2251_v37 = vpack.c.bf16 %v618_v29, %v616_v28  ;;  %v1060_v28 = vld [vmem:[#allocation8 + $0xb0] sm:$0xff] }
 0x11a   : > { %2212 = vmatpush1.bf16.msra.mxu0 %v2211_v34  ;;  %v1039_v34 = vld [vmem:[#allocation8 + $0x8] sm:$0xff] }
 0x11b   : > { %2214 = vmatprep.subr.bf16.mxu0 %v2213_v35  ;;  %v1041_v35 = vld [vmem:[#allocation8 + $0x18] sm:$0xff] }
 0x11c   : > { %v2373_v38 = vpack.c.bf16 %v1041_v35, %v1039_v34  ;;  %v643_v34 = vld [vmem:[#allocation7 + $0x3f8] sm:$0xff] }
 0x11d   : > { %817 = vmatmul.mubr.f32.vlgmr.msra.gmra.mrb[0].mxu0 %v509_v40  ;;  %v1043_v40 = vld [vmem:[#allocation8 + $0x28] sm:$0xff] }
 0x11e   : > { %2216 = vmatpush1.bf16.msra.mxu0 %v2215_v41  ;;  %887 = vmatprep.mubr.f32.mxu0 %v512_v45  ;;  %v1045_v41 = vld [vmem:[#allocation8 + $0x38] sm:$0xff]  ;;  %v1042_v45 = vld [vmem:[#allocation8 + $0x20] sm:$0xff] }
 0x11f   : > { %2218 = vmatprep.subr.bf16.mxu0 %v2217_v42  ;;  %v2253_v42 = vpack.c.bf16 %v623_v31, %v621_v30  ;;  %v2377_v44 = vpack.c.bf16 %v1045_v41, %v1043_v40  ;;  %2374 = vmatprep.subr.bf16.mxu1 %v2373_v38  ;;  %v2379_v51 = vpack.c.bf16 %v1044_v46, %v1042_v45  ;;  %v638_v30 = vld [vmem:[#allocation7 + $0x3d0] sm:$0xff]  ;;  %v1063_v31 = vld [vmem:[#allocation8 + $0xc8] sm:$0xff]  ;;  %v647_v46 = vld [vmem:[#allocation7 + $0x418] sm:$0xff] }
 0x120   : > { %2376 = vmatpush1.bf16.msra.mxu1 %v2375_v43  ;;  %v2271_v36 = vpack.c.bf16 %v638_v30, %v636_v25  ;;  %v2397_v38 = vpack.c.bf16 %v1065_v32, %v1063_v31  ;;  %v1064_v40 = vld [vmem:[#allocation8 + $0xd0] sm:$0xff]  ;;  %v2273_v41 = vpack.c.bf16 %v643_v34, %v641_v33  ;;  %v1067_v43 = vld [vmem:[#allocation8 + $0xe8] sm:$0xff]  ;;  %v1078_v25 = vld [vmem:[#allocation8 + $0x140] sm:$0xff] }
 0x121   : > { %2378 = vmatprep.subr.bf16.mxu1 %v2377_v44  ;;  %v1069_v44 = vld [vmem:[#allocation8 + $0xf8] sm:$0xff]  ;;  %v645_v45 = vld [vmem:[#allocation7 + $0x408] sm:$0xff] }
 0x122   : > { %2220 = vmatpush1.bf16.msra.mxu0 %v2219_v48  ;;  %v625_v48 = vld [vmem:[#allocation7 + $0x368] sm:$0xff]  ;;  %v1085_v30 = vld [vmem:[#allocation8 + $0x178] sm:$0xff] }
 0x123   : > { %2222 = vmatprep.subr.bf16.mxu0 %v2221_v49  ;;  %v627_v49 = vld [vmem:[#allocation7 + $0x378] sm:$0xff]  ;;  %v661_v31 = vld [vmem:[#allocation7 + $0x488] sm:$0xff] }
 0x124   : > { %v2257_v57 = vpack.c.bf16 %v627_v49, %v625_v48  ;;  %2380 = vmatpush1.bf16.msra.mxu1 %v2379_v51  ;;  %v2401_v49 = vpack.c.bf16 %v1069_v44, %v1067_v43  ;;  %v1068_v51 = vld [vmem:[#allocation8 + $0xf0] sm:$0xff]  ;;  %v663_v32 = vld [vmem:[#allocation7 + $0x498] sm:$0xff]  ;;  %v665_v43 = vld [vmem:[#allocation7 + $0x4a8] sm:$0xff] }
 0x125   : > { %v667_v44 = vld [vmem:[#allocation7 + $0x4b8] sm:$0xff] }
 0x126   : > { %2224 = vmatpush1.bf16.msra.mxu0 %v2223_v54  ;;  %v2381_v54 = vpack.c.bf16 %v1049_v50, %v1047_v47  ;;  %v2399_v47 = vpack.c.bf16 %v1064_v40, %v1062_v39  ;;  %v1066_v50 = vld [vmem:[#allocation8 + $0xe0] sm:$0xff]  ;;  %v2293_v39 = vpack.c.bf16 %v663_v32, %v661_v31  ;;  %v662_v40 = vld [vmem:[#allocation7 + $0x490] sm:$0xff] }
 0x127   : > { %2226 = vmatprep.subr.bf16.mxu0 %v2225_v55  ;;  %v1046_v55 = vld [vmem:[#allocation8 + $0x40] sm:$0xff] }
 0x128   : > { %v2383_v63 = vpack.c.bf16 %v1048_v56, %v1046_v55  ;;  %2382 = vmatprep.subr.bf16.mxu1 %v2381_v54  ;;  %v646_v54 = vld [vmem:[#allocation7 + $0x410] sm:$0xff]  ;;  %v649_v55 = vld [vmem:[#allocation7 + $0x428] sm:$0xff]  ;;  %v651_v56 = vld [vmem:[#allocation7 + $0x438] sm:$0xff] }
 0x12a   : > { %2228 = vmatpush1.bf16.msra.mxu0 %v2227_v60  ;;  %v1053_v60 = vld [vmem:[#allocation8 + $0x78] sm:$0xff]  ;;  %2384 = vmatpush1.bf16.msra.mxu1 %v2383_v63  ;;  %v650_v63 = vld [vmem:[#allocation7 + $0x430] sm:$0xff] }
 0x12b   : > { %2230 = vmatprep.subr.bf16.mxu0 %v2229_v61  ;;  %v629_v61 = vld [vmem:[#allocation7 + $0x388] sm:$0xff] }
 0x12c   : > { %v2261_v5 = vpack.c.bf16 %v631_v62, %v629_v61  ;;  %v2403_v61 = vpack.c.bf16 %v1068_v51, %v1066_v50  ;;  %v2279_v62 = vpack.c.bf16 %v646_v54, %v644_v53  ;;  %v1088_v50 = vld [vmem:[#allocation8 + $0x190] sm:$0xff]  ;;  %v2297_v51 = vpack.c.bf16 %v667_v44, %v665_v43  ;;  %v1091_v53 = vld [vmem:[#allocation8 + $0x1a8] sm:$0xff]  ;;  %v1093_v54 = vld [vmem:[#allocation8 + $0x1b8] sm:$0xff] }
 0x12e   : > { %2232 = vmatpush1.bf16.msra.mxu0 %v2231_v2  ;;  %v2385_v2 = vpack.c.bf16 %v1053_v60, %v1051_v59  ;;  %v511_v59 = vld [vmem:[%s3454_s22 + $0x10] sm:$0xff]  ;;  %v648_v60 = vld [vmem:[#allocation7 + $0x420] sm:$0xff] }
 0x12f   : > { %2234 = vmatprep.subr.bf16.mxu0 %v2233_v3  ;;  %v1050_v3 = vld [vmem:[#allocation8 + $0x60] sm:$0xff] }
 0x130   : > { %v2387_v11 = vpack.c.bf16 %v1052_v4, %v1050_v3  ;;  %2386 = vmatprep.subr.bf16.mxu1 %v2385_v2  ;;  %v2281_v2 = vpack.c.bf16 %v651_v56, %v649_v55  ;;  %v514_v3 = vld [vmem:[%s3454_s22 + $0x28] sm:$0xff]  ;;  %v671_v56 = vld [vmem:[#allocation7 + $0x4d8] sm:$0xff] }
 0x131   : > { %v669_v55 = vld [vmem:[#allocation7 + $0x4c8] sm:$0xff] }
 0x132   : > { %2236 = vmatpush1.bf16.msra.mxu0 %v2235_v8  ;;  %v1057_v8 = vld [vmem:[#allocation8 + $0x98] sm:$0xff]  ;;  %2388 = vmatpush1.bf16.msra.mxu1 %v2387_v11  ;;  %v652_v11 = vld [vmem:[#allocation7 + $0x440] sm:$0xff] }
 0x133   : > { %2238 = vmatprep.subr.bf16.mxu0 %v2237_v9  ;;  %v633_v9 = vld [vmem:[#allocation7 + $0x3a8] sm:$0xff] }
 0x134   : > { %v2265_v17 = vpack.c.bf16 %v635_v10, %v633_v9  ;;  %v2283_v10 = vpack.c.bf16 %v650_v63, %v648_v60  ;;  %v2425_v60 = vpack.c.bf16 %v1093_v54, %v1091_v53  ;;  %v2301_v63 = vpack.c.bf16 %v671_v56, %v669_v55  ;;  %v705_v53 = vld [vmem:[#allocation7 + $0x5e8] sm:$0xff]  ;;  %v707_v54 = vld [vmem:[#allocation7 + $0x5f8] sm:$0xff] }
 0x135   : > { %v2337_v56 = vpack.c.bf16 %v707_v54, %v705_v53  ;;  %v1098_v53 = vld [vmem:[#allocation8 + $0x1e0] sm:$0xff]  ;;  %v1100_v54 = vld [vmem:[#allocation8 + $0x1f0] sm:$0xff] }
 0x136   : > { %2240 = vmatpush1.bf16.msra.mxu0 %v2239_v14  ;;  %v2389_v14 = vpack.c.bf16 %v1057_v8, %v1055_v7  ;;  %v653_v7 = vld [vmem:[#allocation7 + $0x448] sm:$0xff]  ;;  %v655_v8 = vld [vmem:[#allocation7 + $0x458] sm:$0xff] }
 0x137   : > { %2242 = vmatprep.subr.bf16.mxu0 %v2241_v15  ;;  %v1054_v15 = vld [vmem:[#allocation8 + $0x80] sm:$0xff] }
 0x138   : > { %v2391_v23 = vpack.c.bf16 %v1056_v16, %v1054_v15  ;;  %2390 = vmatprep.subr.bf16.mxu1 %v2389_v14  ;;  %v1076_v14 = vld [vmem:[#allocation8 + $0x130] sm:$0xff]  ;;  %v2285_v15 = vpack.c.bf16 %v655_v8, %v653_v7 }
 0x139   : > { %v654_v16 = vld [vmem:[#allocation7 + $0x450] sm:$0xff] }
 0x13a   : > { %2244 = vmatpush1.bf16.msra.mxu0 %v2243_v20  ;;  %v1061_v20 = vld [vmem:[#allocation8 + $0xb8] sm:$0xff]  ;;  %2392 = vmatpush1.bf16.msra.mxu1 %v2391_v23  ;;  %v656_v23 = vld [vmem:[#allocation7 + $0x460] sm:$0xff] }
 0x13b   : > { %2246 = vmatprep.subr.bf16.mxu0 %v2245_v21  ;;  %v637_v21 = vld [vmem:[#allocation7 + $0x3c8] sm:$0xff] }
 0x13c   : > { %v2269_v29 = vpack.c.bf16 %v639_v22, %v637_v21  ;;  %v2411_v21 = vpack.c.bf16 %v1076_v14, %v1074_v13  ;;  %v2287_v22 = vpack.c.bf16 %v654_v16, %v652_v11  ;;  %v677_v11 = vld [vmem:[#allocation7 + $0x508] sm:$0xff]  ;;  %v678_v16 = vld [vmem:[#allocation7 + $0x510] sm:$0xff] }
 0x13e   : > { %2248 = vmatpush1.bf16.msra.mxu0 %v2247_v26  ;;  %v2393_v26 = vpack.c.bf16 %v1061_v20, %v1059_v19  ;;  %v657_v19 = vld [vmem:[#allocation7 + $0x468] sm:$0xff]  ;;  %v659_v20 = vld [vmem:[#allocation7 + $0x478] sm:$0xff] }
 0x13f   : > { %2250 = vmatprep.subr.bf16.mxu0 %v2249_v27  ;;  %v1058_v27 = vld [vmem:[#allocation8 + $0xa0] sm:$0xff] }
 0x140   : > { %v2395_v35 = vpack.c.bf16 %v1060_v28, %v1058_v27  ;;  %2394 = vmatprep.subr.bf16.mxu1 %v2393_v26  ;;  %v1080_v26 = vld [vmem:[#allocation8 + $0x150] sm:$0xff]  ;;  %v2289_v27 = vpack.c.bf16 %v659_v20, %v657_v19 }
 0x141   : > { %v658_v28 = vld [vmem:[#allocation7 + $0x470] sm:$0xff]  ;;  %v2415_v33 = vpack.c.bf16 %v1080_v26, %v1078_v25 }
 0x142   : > { %2252 = vmatpush1.bf16.msra.mxu0 %v2251_v37  ;;  %v640_v37 = vld [vmem:[#allocation7 + $0x3e0] sm:$0xff]  ;;  %2396 = vmatpush1.bf16.msra.mxu1 %v2395_v35  ;;  %v2291_v34 = vpack.c.bf16 %v658_v28, %v656_v23  ;;  %v685_v23 = vld [vmem:[#allocation7 + $0x548] sm:$0xff]  ;;  %v686_v28 = vld [vmem:[#allocation7 + $0x550] sm:$0xff] }
 0x143   : > { %2254 = vmatprep.subr.bf16.mxu0 %v2253_v42  ;;  %v642_v42 = vld [vmem:[#allocation7 + $0x3f0] sm:$0xff]  ;;  %2398 = vmatprep.subr.bf16.mxu1 %v2397_v38  ;;  %v660_v35 = vld [vmem:[#allocation7 + $0x480] sm:$0xff] }
 0x144   : > { %v2275_v48 = vpack.c.bf16 %v642_v42, %v640_v37  ;;  %v1082_v37 = vld [vmem:[#allocation8 + $0x160] sm:$0xff]  ;;  %v1084_v38 = vld [vmem:[#allocation8 + $0x170] sm:$0xff]  ;;  %v1089_v42 = vld [vmem:[#allocation8 + $0x198] sm:$0xff] }
 0x146   : > { %2256 = vmatpush1.bf16.msra.mxu0 %v2255_v52  ;;  %v2277_v52 = vpack.c.bf16 %v647_v46, %v645_v45  ;;  %2400 = vmatpush1.bf16.msra.mxu1 %v2399_v47  ;;  %v2419_v45 = vpack.c.bf16 %v1084_v38, %v1082_v37  ;;  %v2295_v46 = vpack.c.bf16 %v662_v40, %v660_v35  ;;  %v664_v47 = vld [vmem:[#allocation7 + $0x4a0] sm:$0xff]  ;;  %v693_v35 = vld [vmem:[#allocation7 + $0x588] sm:$0xff]  ;;  %v694_v40 = vld [vmem:[#allocation7 + $0x590] sm:$0xff] }
 0x147   : > { %2258 = vmatprep.subr.bf16.mxu0 %v2257_v57  ;;  %v1071_v57 = vld [vmem:[#allocation8 + $0x108] sm:$0xff]  ;;  %2402 = vmatprep.subr.bf16.mxu1 %v2401_v49  ;;  %v1086_v49 = vld [vmem:[#allocation8 + $0x180] sm:$0xff] }
 0x148   : > { %v2405_v4 = vpack.c.bf16 %v1073_v58, %v1071_v57  ;;  %v2423_v57 = vpack.c.bf16 %v1088_v50, %v1086_v49 }
 0x14a   : > { %2260 = vmatpush1.bf16.msra.mxu0 %v2259_v0  ;;  %v1070_v0 = vld [vmem:[#allocation8 + $0x100] sm:$0xff]  ;;  %2404 = vmatpush1.bf16.msra.mxu1 %v2403_v61 }
 0x14b   : > { %2262 = vmatprep.subr.bf16.mxu0 %v2261_v5  ;;  %v1075_v5 = vld [vmem:[#allocation8 + $0x128] sm:$0xff]  ;;  %v2407_v9 = vpack.c.bf16 %v1072_v1, %v1070_v0  ;;  %2406 = vmatprep.subr.bf16.mxu1 %v2405_v4  ;;  %v1090_v61 = vld [vmem:[#allocation8 + $0x1a0] sm:$0xff]  ;;  %v670_v0 = vld [vmem:[#allocation7 + $0x4d0] sm:$0xff] }
 0x14c   : > { %v1095_v1 = vld [vmem:[#allocation8 + $0x1c8] sm:$0xff]  ;;  %v675_v4 = vld [vmem:[#allocation7 + $0x4f8] sm:$0xff] }
 0x14e   : > { %2264 = vmatpush1.bf16.msra.mxu0 %v2263_v12  ;;  %v2409_v12 = vpack.c.bf16 %v1077_v6, %v1075_v5  ;;  %2408 = vmatpush1.bf16.msra.mxu1 %v2407_v9  ;;  %v672_v9 = vld [vmem:[#allocation7 + $0x4e0] sm:$0xff] }
 0x14f   : > { %2266 = vmatprep.subr.bf16.mxu0 %v2265_v17  ;;  %v1079_v17 = vld [vmem:[#allocation8 + $0x148] sm:$0xff] }
 0x150   : > { %2410 = vmatprep.subr.bf16.mxu1 %v2409_v12  ;;  %v679_v12 = vld [vmem:[#allocation7 + $0x518] sm:$0xff] }
 0x151   : > { %v2309_v14 = vpack.c.bf16 %v679_v12, %v677_v11  ;;  %v3133_v11 = vmov 0.0  }
 0x152   : > { %2268 = vmatpush1.bf16.msra.mxu0 %v2267_v24  ;;  %v2413_v24 = vpack.c.bf16 %v1081_v18, %v1079_v17  ;;  %2412 = vmatpush1.bf16.msra.mxu1 %v2411_v21  ;;  %v681_v17 = vld [vmem:[#allocation7 + $0x528] sm:$0xff]  ;;  %v683_v18 = vld [vmem:[#allocation7 + $0x538] sm:$0xff]  ;;  %v680_v21 = vld [vmem:[#allocation7 + $0x520] sm:$0xff] }
 0x153   : > { %2270 = vmatprep.subr.bf16.mxu0 %v2269_v29  ;;  %v1083_v29 = vld [vmem:[#allocation8 + $0x168] sm:$0xff]  ;;  %v2313_v20 = vpack.c.bf16 %v683_v18, %v681_v17 }
 0x154   : > { %2414 = vmatprep.subr.bf16.mxu1 %v2413_v24  ;;  %v687_v24 = vld [vmem:[#allocation7 + $0x558] sm:$0xff] }
 0x155   : > { %v2317_v26 = vpack.c.bf16 %v687_v24, %v685_v23 }
 0x156   : > { %2272 = vmatpush1.bf16.msra.mxu0 %v2271_v36  ;;  %v2417_v36 = vpack.c.bf16 %v1085_v30, %v1083_v29  ;;  %2416 = vmatpush1.bf16.msra.mxu1 %v2415_v33  ;;  %v689_v29 = vld [vmem:[#allocation7 + $0x568] sm:$0xff]  ;;  %v691_v30 = vld [vmem:[#allocation7 + $0x578] sm:$0xff]  ;;  %v688_v33 = vld [vmem:[#allocation7 + $0x560] sm:$0xff] }
 0x157   : > { %2274 = vmatprep.subr.bf16.mxu0 %v2273_v41  ;;  %v1087_v41 = vld [vmem:[#allocation8 + $0x188] sm:$0xff]  ;;  %v2321_v32 = vpack.c.bf16 %v691_v30, %v689_v29 }
 0x158   : > { %2418 = vmatprep.subr.bf16.mxu1 %v2417_v36  ;;  %v695_v36 = vld [vmem:[#allocation7 + $0x598] sm:$0xff] }
 0x159   : > { %v2325_v38 = vpack.c.bf16 %v695_v36, %v693_v35 }
 0x15a   : > { %2276 = vmatpush1.bf16.msra.mxu0 %v2275_v48  ;;  %v2421_v48 = vpack.c.bf16 %v1089_v42, %v1087_v41  ;;  %2420 = vmatpush1.bf16.msra.mxu1 %v2419_v45  ;;  %v697_v41 = vld [vmem:[#allocation7 + $0x5a8] sm:$0xff]  ;;  %v699_v42 = vld [vmem:[#allocation7 + $0x5b8] sm:$0xff]  ;;  %v696_v45 = vld [vmem:[#allocation7 + $0x5a0] sm:$0xff] }
 0x15b   : > { %2278 = vmatprep.subr.bf16.mxu0 %v2277_v52  ;;  %v666_v52 = vld [vmem:[#allocation7 + $0x4b0] sm:$0xff]  ;;  %v2329_v44 = vpack.c.bf16 %v699_v42, %v697_v41 }
 0x15c   : > { %v2299_v58 = vpack.c.bf16 %v666_v52, %v664_v47  ;;  %2422 = vmatprep.subr.bf16.mxu1 %v2421_v48  ;;  %v701_v47 = vld [vmem:[#allocation7 + $0x5c8] sm:$0xff]  ;;  %v703_v48 = vld [vmem:[#allocation7 + $0x5d8] sm:$0xff]  ;;  %v702_v52 = vld [vmem:[#allocation7 + $0x5d0] sm:$0xff] }
 0x15d   : > { %888 = vmatmul.mubr.f32.vlgmr.msra.gmra.mrb[0].mxu0 %v511_v59  ;;  %v668_v59 = vld [vmem:[#allocation7 + $0x4c0] sm:$0xff]  ;;  %v2333_v50 = vpack.c.bf16 %v703_v48, %v701_v47  ;;  %v1096_v48 = vld [vmem:[#allocation8 + $0x1d0] sm:$0xff] }
 0x15e   : > { %2280 = vmatpush1.bf16.msra.mxu0 %v2279_v62  ;;  %958 = vmatprep.mubr.f32.mxu0 %v514_v3  ;;  %v1092_v62 = vld [vmem:[#allocation8 + $0x1b0] sm:$0xff]  ;;  %v673_v3 = vld [vmem:[#allocation7 + $0x4e8] sm:$0xff]  ;;  %v2303_v6 = vpack.c.bf16 %v670_v0, %v668_v59  ;;  %v1094_v47 = vld [vmem:[#allocation8 + $0x1c0] sm:$0xff] }
 0x15f   : > { %2282 = vmatprep.subr.bf16.mxu0 %v2281_v2  ;;  %v1097_v2 = vld [vmem:[#allocation8 + $0x1d8] sm:$0xff]  ;;  %2424 = vmatpush1.bf16.msra.mxu1 %v2423_v57  ;;  %v2427_v5 = vpack.c.bf16 %v1092_v62, %v1090_v61  ;;  %v2305_v8 = vpack.c.bf16 %v675_v4, %v673_v3  ;;  %v704_v57 = vld [vmem:[#allocation7 + $0x5e0] sm:$0xff]  ;;  %v709_v59 = vld [vmem:[#allocation7 + $0x608] sm:$0xff] }
 0x160   : > { %2426 = vmatprep.subr.bf16.mxu1 %v2425_v60  ;;  %v2429_v7 = vpack.c.bf16 %v1097_v2, %v1095_v1  ;;  %v711_v60 = vld [vmem:[#allocation7 + $0x618] sm:$0xff]  ;;  %v710_v0 = vld [vmem:[#allocation7 + $0x610] sm:$0xff]  ;;  %v713_v1 = vld [vmem:[#allocation7 + $0x628] sm:$0xff] }
 0x161   : > { %v2341_v62 = vpack.c.bf16 %v711_v60, %v709_v59  ;;  %v715_v2 = vld [vmem:[#allocation7 + $0x638] sm:$0xff]  ;;  %v742_v59 = vlaneseq }
 0x162   : > { %2284 = vmatpush1.bf16.msra.mxu0 %v2283_v10  ;;  %v674_v10 = vld [vmem:[#allocation7 + $0x4f0] sm:$0xff]  ;;  %v513_v3 = vld [vmem:[%s3454_s22 + $0x20] sm:$0xff] }
 0x163   : > { %2286 = vmatprep.subr.bf16.mxu0 %v2285_v15  ;;  %2428 = vmatpush1.bf16.msra.mxu1 %v2427_v5  ;;  %v2307_v13 = vpack.c.bf16 %v674_v10, %v672_v9  ;;  %v676_v15 = vld [vmem:[#allocation7 + $0x500] sm:$0xff]  ;;  %v2345_v5 = vpack.c.bf16 %v715_v2, %v713_v1  ;;  %v719_v9 = vld [vmem:[#allocation7 + $0x658] sm:$0xff]  ;;  %v3488_v60 = vshrl.u32 %v742_v59, 7 }
 0x164   : > { %2430 = vmatprep.subr.bf16.mxu1 %v2429_v7  ;;  %v2311_v19 = vpack.c.bf16 %v678_v16, %v676_v15  ;;  %v714_v7 = vld [vmem:[#allocation7 + $0x630] sm:$0xff]  ;;  %v721_v15 = vld [vmem:[#allocation7 + $0x668] sm:$0xff]  ;;  %v723_v16 = vld [vmem:[#allocation7 + $0x678] sm:$0xff] }
 0x165   : > { %v2353_v18 = vpack.c.bf16 %v723_v16, %v721_v15  ;;  %v1192_v15 = vld [vmem:[#allocation10 + $0x20] sm:$0xff]  ;;  %v1194_v16 = vld [vmem:[#allocation10 + $0x30] sm:$0xff] }
 0x166   : > { %2288 = vmatpush1.bf16.msra.mxu0 %v2287_v22  ;;  %v682_v22 = vld [vmem:[#allocation7 + $0x530] sm:$0xff]  ;;  %v1309_v59 = vld [vmem:[#allocation11 + $0x20] sm:$0xff] }
 0x167   : > { %2290 = vmatprep.subr.bf16.mxu0 %v2289_v27  ;;  %v2315_v25 = vpack.c.bf16 %v682_v22, %v680_v21  ;;  %v684_v27 = vld [vmem:[#allocation7 + $0x540] sm:$0xff]  ;;  %v725_v21 = vld [vmem:[#allocation7 + $0x688] sm:$0xff]  ;;  %v727_v22 = vld [vmem:[#allocation7 + $0x698] sm:$0xff] }
 0x168   : > { %v2319_v31 = vpack.c.bf16 %v686_v28, %v684_v27  ;;  %v2357_v24 = vpack.c.bf16 %v727_v22, %v725_v21  ;;  %v729_v27 = vld [vmem:[#allocation7 + $0x6a8] sm:$0xff]  ;;  %v731_v28 = vld [vmem:[#allocation7 + $0x6b8] sm:$0xff]  ;;  %v1196_v21 = vld [vmem:[#allocation10 + $0x40] sm:$0xff] }
 0x169   : > { %v2361_v30 = vpack.c.bf16 %v731_v28, %v729_v27  ;;  %v1198_v22 = vld [vmem:[#allocation10 + $0x50] sm:$0xff]  ;;  %v1200_v27 = vld [vmem:[#allocation10 + $0x60] sm:$0xff] }
 0x16a   : > { %2292 = vmatpush1.bf16.msra.mxu0 %v2291_v34  ;;  %v690_v34 = vld [vmem:[#allocation7 + $0x570] sm:$0xff] }
 0x16b   : > { %2294 = vmatprep.subr.bf16.mxu0 %v2293_v39  ;;  %v2323_v37 = vpack.c.bf16 %v690_v34, %v688_v33  ;;  %v692_v39 = vld [vmem:[#allocation7 + $0x580] sm:$0xff]  ;;  %v733_v33 = vld [vmem:[#allocation7 + $0x6c8] sm:$0xff]  ;;  %v735_v34 = vld [vmem:[#allocation7 + $0x6d8] sm:$0xff] }
 0x16c   : > { %v2327_v43 = vpack.c.bf16 %v694_v40, %v692_v39  ;;  %v2365_v36 = vpack.c.bf16 %v735_v34, %v733_v33  ;;  %v737_v39 = vld [vmem:[#allocation7 + $0x6e8] sm:$0xff]  ;;  %v739_v40 = vld [vmem:[#allocation7 + $0x6f8] sm:$0xff]  ;;  %v1202_v28 = vld [vmem:[#allocation10 + $0x70] sm:$0xff] }
 0x16d   : > { %v2369_v42 = vpack.c.bf16 %v739_v40, %v737_v39  ;;  %v1204_v33 = vld [vmem:[#allocation10 + $0x80] sm:$0xff]  ;;  %v1209_v34 = vld [vmem:[#allocation10 + $0xa8] sm:$0xff]  ;;  %v1210_v39 = vld [vmem:[#allocation10 + $0xb0] sm:$0xff] }
 0x16e   : > { %2296 = vmatpush1.bf16.msra.mxu0 %v2295_v46  ;;  %v698_v46 = vld [vmem:[#allocation7 + $0x5b0] sm:$0xff] }
 0x16f   : > { %2298 = vmatprep.subr.bf16.mxu0 %v2297_v51  ;;  %v2331_v49 = vpack.c.bf16 %v698_v46, %v696_v45  ;;  %v700_v51 = vld [vmem:[#allocation7 + $0x5c0] sm:$0xff]  ;;  %v515_v46 = vld [vmem:[%s3454_s22 + $0x30] sm:$0xff]  ;;  %s3686_s22 = sld [smem:[#allocation27_spill]] }
 0x170   : > { %v2335_v55 = vpack.c.bf16 %v702_v52, %v700_v51  ;;  %v1101_v51 = vld [vmem:[#allocation8 + $0x1f8] sm:$0xff] }
 0x172   : > { %2300 = vmatpush1.bf16.msra.mxu0 %v2299_v58  ;;  %v706_v58 = vld [vmem:[#allocation7 + $0x5f0] sm:$0xff] }
 0x173   : > { %2302 = vmatprep.subr.bf16.mxu0 %v2301_v63  ;;  %v2339_v61 = vpack.c.bf16 %v706_v58, %v704_v57  ;;  %v708_v63 = vld [vmem:[#allocation7 + $0x600] sm:$0xff]  ;;  %v1191_v57 = vld [vmem:[#allocation10 + $0x18] sm:$0xff] }
 0x174   : > { %v2343_v4 = vpack.c.bf16 %v710_v0, %v708_v63  ;;  %v3497_v63 = vsub.s32 1, %v3488_v60 }
 0x176   : > { %2304 = vmatpush1.bf16.msra.mxu0 %v2303_v6  ;;  %v712_v6 = vld [vmem:[#allocation7 + $0x620] sm:$0xff] }
 0x177   : > { %2306 = vmatprep.subr.bf16.mxu0 %v2305_v8  ;;  %v717_v8 = vld [vmem:[#allocation7 + $0x648] sm:$0xff]  ;;  %v2347_v10 = vpack.c.bf16 %v714_v7, %v712_v6  ;;  %v1190_v6 = vld [vmem:[#allocation10 + $0x10] sm:$0xff] }
 0x178   : > { %v2349_v12 = vpack.c.bf16 %v719_v9, %v717_v8  ;;  %v1193_v8 = vld [vmem:[#allocation10 + $0x28] sm:$0xff]  ;;  %v1195_v9 = vld [vmem:[#allocation10 + $0x38] sm:$0xff] }
 0x17a   : > { %2308 = vmatpush1.bf16.msra.mxu0 %v2307_v13  ;;  %v716_v13 = vld [vmem:[#allocation7 + $0x640] sm:$0xff] }
 0x17b   : > { %2310 = vmatprep.subr.bf16.mxu0 %v2309_v14  ;;  %v718_v14 = vld [vmem:[#allocation7 + $0x650] sm:$0xff] }
 0x17c   : > { %v2351_v17 = vpack.c.bf16 %v718_v14, %v716_v13  ;;  %v2441_v14 = vpack.c.bf16 %v1195_v9, %v1193_v8  ;;  %v1345_v8 = vld [vmem:[#allocation11 + $0x140] sm:$0xff] }
 0x17d   : > { %v1337_v9 = vld [vmem:[#allocation11 + $0x100] sm:$0xff] }
 0x17e   : > { %2312 = vmatpush1.bf16.msra.mxu0 %v2311_v19  ;;  %v720_v19 = vld [vmem:[#allocation7 + $0x660] sm:$0xff] }
 0x17f   : > { %2314 = vmatprep.subr.bf16.mxu0 %v2313_v20  ;;  %v722_v20 = vld [vmem:[#allocation7 + $0x670] sm:$0xff] }
 0x180   : > { %v2355_v23 = vpack.c.bf16 %v722_v20, %v720_v19  ;;  %v2443_v19 = vpack.c.bf16 %v1194_v16, %v1192_v15  ;;  %v1359_v15 = vld [vmem:[#allocation11 + $0x1b0] sm:$0xff] }
 0x181   : > { %v1351_v16 = vld [vmem:[#allocation11 + $0x170] sm:$0xff] }
 0x182   : > { %2316 = vmatpush1.bf16.msra.mxu0 %v2315_v25  ;;  %v724_v25 = vld [vmem:[#allocation7 + $0x680] sm:$0xff] }
 0x183   : > { %2318 = vmatprep.subr.bf16.mxu0 %v2317_v26  ;;  %v726_v26 = vld [vmem:[#allocation7 + $0x690] sm:$0xff] }
 0x184   : > { %v2359_v29 = vpack.c.bf16 %v726_v26, %v724_v25  ;;  %v2447_v25 = vpack.c.bf16 %v1198_v22, %v1196_v21  ;;  %v1373_v21 = vld [vmem:[#allocation11 + $0x220] sm:$0xff] }
 0x185   : > { %v1365_v22 = vld [vmem:[#allocation11 + $0x1e0] sm:$0xff] }
 0x186   : > { %2320 = vmatpush1.bf16.msra.mxu0 %v2319_v31  ;;  %v728_v31 = vld [vmem:[#allocation7 + $0x6a0] sm:$0xff] }
 0x187   : > { %2322 = vmatprep.subr.bf16.mxu0 %v2321_v32  ;;  %v730_v32 = vld [vmem:[#allocation7 + $0x6b0] sm:$0xff] }
 0x188   : > { %v2363_v35 = vpack.c.bf16 %v730_v32, %v728_v31  ;;  %v2451_v31 = vpack.c.bf16 %v1202_v28, %v1200_v27  ;;  %v1387_v27 = vld [vmem:[#allocation11 + $0x290] sm:$0xff] }
 0x189   : > { %v1379_v28 = vld [vmem:[#allocation11 + $0x250] sm:$0xff] }
 0x18a   : > { %2324 = vmatpush1.bf16.msra.mxu0 %v2323_v37  ;;  %v732_v37 = vld [vmem:[#allocation7 + $0x6c0] sm:$0xff] }
 0x18b   : > { %2326 = vmatprep.subr.bf16.mxu0 %v2325_v38  ;;  %v734_v38 = vld [vmem:[#allocation7 + $0x6d0] sm:$0xff] }
 0x18c   : > { %v2367_v41 = vpack.c.bf16 %v734_v38, %v732_v37  ;;  %v1208_v38 = vld [vmem:[#allocation10 + $0xa0] sm:$0xff] }
 0x18d   : > { %v2459_v40 = vpack.c.bf16 %v1210_v39, %v1208_v38  ;;  %v1415_v38 = vld [vmem:[#allocation11 + $0x370] sm:$0xff] }
 0x18e   : > { %2328 = vmatpush1.bf16.msra.mxu0 %v2327_v43  ;;  %v736_v43 = vld [vmem:[#allocation7 + $0x6e0] sm:$0xff]  ;;  %v1407_v39 = vld [vmem:[#allocation11 + $0x330] sm:$0xff] }
 0x18f   : > { %2330 = vmatprep.subr.bf16.mxu0 %v2329_v44  ;;  %v738_v44 = vld [vmem:[#allocation7 + $0x6f0] sm:$0xff] }
 0x190   : > { %v2371_v45 = vpack.c.bf16 %v738_v44, %v736_v43  ;;  %v1212_v44 = vld [vmem:[#allocation10 + $0xc0] sm:$0xff] }
 0x192   : > { %2332 = vmatpush1.bf16.msra.mxu0 %v2331_v49  ;;  %v2431_v49 = vpack.c.bf16 %v1096_v48, %v1094_v47  ;;  %v1217_v47 = vld [vmem:[#allocation10 + $0xe8] sm:$0xff]  ;;  %v1219_v48 = vld [vmem:[#allocation10 + $0xf8] sm:$0xff] }
 0x193   : > { %2334 = vmatprep.subr.bf16.mxu0 %v2333_v50  ;;  %v1099_v50 = vld [vmem:[#allocation8 + $0x1e8] sm:$0xff] }
 0x194   : > { %2432 = vmatpush1.bf16.msra.mxu1 %v2431_v49  ;;  %v2433_v52 = vpack.c.bf16 %v1101_v51, %v1099_v50  ;;  %v2465_v49 = vpack.c.bf16 %v1219_v48, %v1217_v47  ;;  %v1216_v50 = vld [vmem:[#allocation10 + $0xe0] sm:$0xff]  ;;  %v1218_v51 = vld [vmem:[#allocation10 + $0xf0] sm:$0xff]  ;;  %v1428_v47 = vld [vmem:[#allocation11 + $0x3d8] sm:$0xff] }
 0x196   : > { %2336 = vmatpush1.bf16.msra.mxu0 %v2335_v55  ;;  %v2435_v55 = vpack.c.bf16 %v1100_v54, %v1098_v53  ;;  %2434 = vmatprep.subr.bf16.mxu1 %v2433_v52  ;;  %v2467_v52 = vpack.c.bf16 %v1218_v51, %v1216_v50  ;;  %v1306_v53 = vld [vmem:[#allocation11 + $0x8] sm:$0xff]  ;;  %v1313_v54 = vld [vmem:[#allocation11 + $0x40] sm:$0xff]  ;;  %v1443_v50 = vld [vmem:[#allocation11 + $0x450] sm:$0xff] }
 0x197   : > { %2338 = vmatprep.subr.bf16.mxu0 %v2337_v56  ;;  %v1189_v56 = vld [vmem:[#allocation10 + $0x8] sm:$0xff]  ;;  %v1435_v51 = vld [vmem:[#allocation11 + $0x410] sm:$0xff] }
 0x198   : > { %2436 = vmatpush1.bf16.msra.mxu1 %v2435_v55  ;;  %v2437_v58 = vpack.c.bf16 %v1191_v57, %v1189_v56  ;;  %v2469_v55 = vpack.c.bf16 %v1313_v54, %v1306_v53  ;;  %v1310_v56 = vld [vmem:[#allocation11 + $0x28] sm:$0xff]  ;;  %v1317_v57 = vld [vmem:[#allocation11 + $0x60] sm:$0xff] }
 0x199   : > { %v1442_v53 = vld [vmem:[#allocation11 + $0x448] sm:$0xff] }
 0x19a   : > { %2340 = vmatpush1.bf16.msra.mxu0 %v2339_v61  ;;  %2438 = vmatprep.subr.bf16.mxu1 %v2437_v58  ;;  %v3491_v61 = vsub.s32 0, %v3488_v60  ;;  %v2597_v58 = vpack.c.bf16 %v1317_v57, %v1310_v56  ;;  %v2635_v54 = vpack.c.bf16 %v1442_v53, %v1435_v51  ;;  %v1457_v56 = vld [vmem:[#allocation11 + $0x4c0] sm:$0xff]  ;;  %v1362_v51 = vld [vmem:[#allocation11 + $0x1c8] sm:$0xff] }
 0x19b   : > { %2342 = vmatprep.subr.bf16.mxu0 %v2341_v62  ;;  %v740_v62 = vld [vmem:[%s3643_s3] sm:$0x3] }
 0x19c   : > { %v745_v0 = vrot.slane %v740_v62, %v3491_v61  ;;  %v749_v1 = vrot.slane %v740_v62, %v3497_v63  ;;  %v1316_v62 = vld [vmem:[#allocation11 + $0x58] sm:$0xff]  ;;  %v1449_v57 = vld [vmem:[#allocation11 + $0x480] sm:$0xff] }
 0x19d   : > { %959 = vmatmul.mubr.f32.vlgmr.msra.gmra.mrb[0].mxu0 %v513_v3 }
 0x19e   : > { %2344 = vmatpush1.bf16.msra.mxu0 %v2343_v4  ;;  %1029 = vmatprep.mubr.f32.mxu0 %v3133_v11 }
 0x19f   : > { %2346 = vmatprep.subr.bf16.mxu0 %v2345_v5  ;;  %v1188_v5 = vld [vmem:[#allocation10] sm:$0xff] }
 0x1a2   : > { %2348 = vmatpush1.bf16.msra.mxu0 %v2347_v10 }
 0x1a3   : > { %2350 = vmatprep.subr.bf16.mxu0 %v2349_v12  ;;  %v2439_v12 = vpack.c.bf16 %v1190_v6, %v1188_v5  ;;  %v1330_v5 = vld [vmem:[#allocation11 + $0xc8] sm:$0xff] }
 0x1a6   : > { %2352 = vmatpush1.bf16.msra.mxu0 %v2351_v17  ;;  %v1197_v17 = vld [vmem:[#allocation10 + $0x48] sm:$0xff] }
 0x1a7   : > { %2354 = vmatprep.subr.bf16.mxu0 %v2353_v18  ;;  %v1199_v18 = vld [vmem:[#allocation10 + $0x58] sm:$0xff] }
 0x1a8   : > { %v2445_v20 = vpack.c.bf16 %v1199_v18, %v1197_v17  ;;  %v1358_v18 = vld [vmem:[#allocation11 + $0x1a8] sm:$0xff] }
 0x1aa   : > { %2356 = vmatpush1.bf16.msra.mxu0 %v2355_v23  ;;  %v1201_v23 = vld [vmem:[#allocation10 + $0x68] sm:$0xff] }
 0x1ab   : > { %2358 = vmatprep.subr.bf16.mxu0 %v2357_v24  ;;  %v1203_v24 = vld [vmem:[#allocation10 + $0x78] sm:$0xff] }
 0x1ac   : > { %v2449_v26 = vpack.c.bf16 %v1203_v24, %v1201_v23  ;;  %v1372_v24 = vld [vmem:[#allocation11 + $0x218] sm:$0xff] }
 0x1ae   : > { %2360 = vmatpush1.bf16.msra.mxu0 %v2359_v29  ;;  %v1205_v29 = vld [vmem:[#allocation10 + $0x88] sm:$0xff] }
 0x1af   : > { %2362 = vmatprep.subr.bf16.mxu0 %v2361_v30  ;;  %v1207_v30 = vld [vmem:[#allocation10 + $0x98] sm:$0xff] }
 0x1b0   : > { %v2453_v32 = vpack.c.bf16 %v1207_v30, %v1205_v29  ;;  %v1386_v30 = vld [vmem:[#allocation11 + $0x288] sm:$0xff] }
 0x1b2   : > { %2364 = vmatpush1.bf16.msra.mxu0 %v2363_v35  ;;  %v1211_v35 = vld [vmem:[#allocation10 + $0xb8] sm:$0xff] }
 0x1b3   : > { %2366 = vmatprep.subr.bf16.mxu0 %v2365_v36  ;;  %v2457_v37 = vpack.c.bf16 %v1211_v35, %v1209_v34  ;;  %v1400_v35 = vld [vmem:[#allocation11 + $0x2f8] sm:$0xff] }
 0x1b6   : > { %2368 = vmatpush1.bf16.msra.mxu0 %v2367_v41  ;;  %v1213_v41 = vld [vmem:[#allocation10 + $0xc8] sm:$0xff] }
 0x1b7   : > { %2370 = vmatprep.subr.bf16.mxu0 %v2369_v42  ;;  %v1215_v42 = vld [vmem:[#allocation10 + $0xd8] sm:$0xff] }
 0x1b8   : > { %v2461_v43 = vpack.c.bf16 %v1215_v42, %v1213_v41  ;;  %v1414_v41 = vld [vmem:[#allocation11 + $0x368] sm:$0xff] }
 0x1b9   : > { %v2627_v42 = vpack.c.bf16 %v1414_v41, %v1407_v39  ;;  %v1334_v39 = vld [vmem:[#allocation11 + $0xe8] sm:$0xff] }
 0x1ba   : > { %2372 = vmatpush1.bf16.msra.mxu0 %v2371_v45  ;;  %v1214_v45 = vld [vmem:[#allocation10 + $0xd0] sm:$0xff] }
 0x1bb   : > { %2598 = vmatprep.subr.bf16.mxu0 %v2597_v58 }
 0x1bd   : > { %1030 = vmatmul.mubr.f32.vlgmr.msra.gmra.mrb[0].mxu0 %v515_v46  ;;  %v2463_v46 = vpack.c.bf16 %v1214_v45, %v1212_v44  ;;  %v1429_v44 = vld [vmem:[#allocation11 + $0x3e0] sm:$0xff] }
 0x1be   : > { %v1421_v45 = vld [vmem:[#allocation11 + $0x3a0] sm:$0xff] }
 0x1bf   : > { %v2631_v48 = vpack.c.bf16 %v1428_v47, %v1421_v45  ;;  %v1348_v45 = vld [vmem:[#allocation11 + $0x158] sm:$0xff] }
 0x290   : > { %v1031_v2 = vpop.f32.mrb[0].mxu0 }
 0x291   : > { %v2693_v3 = vadd.f32 %v1031_v2, %v745_v0  ;;  %v1033_v4 = vpop.f32.mrb[1].mxu0  ;;  %v2599_v0 = vpack.c.bf16 %v1316_v62, %v1309_v59  ;;  %v1331_v2 = vld [vmem:[#allocation11 + $0xd0] sm:$0xff]  ;;  %v1456_v59 = vld [vmem:[#allocation11 + $0x4b8] sm:$0xff] }
 0x292   : > { %v2694_v7 = vadd.f32 %v1033_v4, %v749_v1  ;;  %v1324_v1 = vld [vmem:[#allocation11 + $0x98] sm:$0xff]  ;;  %v2639_v62 = vpack.c.bf16 %v1456_v59, %v1449_v57 }
 0x293   : > { %v1036_v13 = vmax.f32 %v2693_v3, 0.0  ;;  %2600 = vmatpush1.bf16.msra.mxu0 %v2599_v0  ;;  %v1323_v3 = vld [vmem:[#allocation11 + $0x90] sm:$0xff]  ;;  %v2601_v4 = vpack.c.bf16 %v1331_v2, %v1324_v1  ;;  %v1464_v0 = vld [vmem:[#allocation11 + $0x4f8] sm:$0xff] }
 0x294   : > { %v1037_v10 = vmax.f32 %v2694_v7, 0.0  ;;  %v2603_v6 = vpack.c.bf16 %v1330_v5, %v1323_v3  ;;  %v1338_v7 = vld [vmem:[#allocation11 + $0x108] sm:$0xff]  ;;  %v1471_v1 = vld [vmem:[#allocation11 + $0x530] sm:$0xff]  ;;  %v1376_v57 = vld [vmem:[#allocation11 + $0x238] sm:$0xff] }
 0x295   : > { %2602 = vmatprep.subr.bf16.mxu0 %v2601_v4  ;;  %v1463_v2 = vld [vmem:[#allocation11 + $0x4f0] sm:$0xff]  ;;  %v2641_v3 = vpack.c.bf16 %v1471_v1, %v1464_v0  ;;  %v1470_v4 = vld [vmem:[#allocation11 + $0x528] sm:$0xff] }
 0x296   : > { %1178 = vmatprep.mubr.f32.mxu1 %v1037_v10  ;;  %v2605_v10 = vpack.c.bf16 %v1345_v8, %v1338_v7  ;;  %v2643_v5 = vpack.c.bf16 %v1470_v4, %v1463_v2  ;;  %v1485_v7 = vld [vmem:[#allocation11 + $0x5a0] sm:$0xff]  ;;  %v1375_v0 = vld [vmem:[#allocation11 + $0x230] sm:$0xff]  ;;  %v1382_v1 = vld [vmem:[#allocation11 + $0x268] sm:$0xff] }
 0x297   : > { %1179 = vmatmul.mubr.f32.vlgmr.msra.gmra.mrb[0].mxu1 %v1036_v13  ;;  %2604 = vmatpush1.bf16.msra.mxu0 %v2603_v6  ;;  %v1478_v6 = vld [vmem:[#allocation11 + $0x568] sm:$0xff]  ;;  %v1477_v8 = vld [vmem:[#allocation11 + $0x560] sm:$0xff]  ;;  %v2491_v4 = vpack.c.bf16 %v1382_v1, %v1375_v0  ;;  %v1523_v0 = vld [vmem:[#allocation11 + $0x6d0] sm:$0xff] }
 0x298   : > { %2440 = vmatpush1.bf16.msra.mxu1 %v2439_v12  ;;  %1296 = vmatprep.mubr.f32.mxu1 %v3133_v11  ;;  %v1206_v11 = vld [vmem:[#allocation10 + $0x90] sm:$0xff]  ;;  %v1344_v12 = vld [vmem:[#allocation11 + $0x138] sm:$0xff]  ;;  %v1390_v2 = vld [vmem:[#allocation11 + $0x2a8] sm:$0xff] }
 0x299   : > { %2442 = vmatprep.subr.bf16.mxu1 %v2441_v14  ;;  %v2455_v36 = vpack.c.bf16 %v1206_v11, %v1204_v33  ;;  %v2607_v13 = vpack.c.bf16 %v1344_v12, %v1337_v9  ;;  %2606 = vmatprep.subr.bf16.mxu0 %v2605_v10  ;;  %v1352_v14 = vld [vmem:[#allocation11 + $0x178] sm:$0xff]  ;;  %v1401_v33 = vld [vmem:[#allocation11 + $0x300] sm:$0xff]  ;;  %v2645_v9 = vpack.c.bf16 %v1485_v7, %v1478_v6 }
 0x29a   : > { %v2609_v17 = vpack.c.bf16 %v1359_v15, %v1352_v14  ;;  %v1393_v11 = vld [vmem:[#allocation11 + $0x2c0] sm:$0xff]  ;;  %v1484_v10 = vld [vmem:[#allocation11 + $0x598] sm:$0xff]  ;;  %v1499_v14 = vld [vmem:[#allocation11 + $0x610] sm:$0xff] }
 0x29b   : > { %2608 = vmatpush1.bf16.msra.mxu0 %v2607_v13  ;;  %v2647_v12 = vpack.c.bf16 %v1484_v10, %v1477_v8  ;;  %v1492_v13 = vld [vmem:[#allocation11 + $0x5d8] sm:$0xff]  ;;  %v1491_v15 = vld [vmem:[#allocation11 + $0x5d0] sm:$0xff]  ;;  %v1389_v6 = vld [vmem:[#allocation11 + $0x2a0] sm:$0xff] }
 0x29c   : > { %2444 = vmatpush1.bf16.msra.mxu1 %v2443_v19  ;;  %v2611_v19 = vpack.c.bf16 %v1358_v18, %v1351_v16  ;;  %2610 = vmatprep.subr.bf16.mxu0 %v2609_v17  ;;  %v2649_v16 = vpack.c.bf16 %v1499_v14, %v1492_v13  ;;  %v1498_v17 = vld [vmem:[#allocation11 + $0x608] sm:$0xff]  ;;  %v1396_v7 = vld [vmem:[#allocation11 + $0x2d8] sm:$0xff]  ;;  %v1403_v13 = vld [vmem:[#allocation11 + $0x310] sm:$0xff] }
 0x29d   : > { %2446 = vmatprep.subr.bf16.mxu1 %v2445_v20  ;;  %v1366_v20 = vld [vmem:[#allocation11 + $0x1e8] sm:$0xff]  ;;  %v2651_v18 = vpack.c.bf16 %v1498_v17, %v1491_v15  ;;  %v1404_v8 = vld [vmem:[#allocation11 + $0x318] sm:$0xff]  ;;  %v2495_v10 = vpack.c.bf16 %v1396_v7, %v1389_v6  ;;  %v1527_v6 = vld [vmem:[#allocation11 + $0x6f0] sm:$0xff] }
 0x29e   : > { %v2613_v23 = vpack.c.bf16 %v1373_v21, %v1366_v20  ;;  %v1513_v20 = vld [vmem:[#allocation11 + $0x680] sm:$0xff]  ;;  %v1410_v14 = vld [vmem:[#allocation11 + $0x348] sm:$0xff]  ;;  %v1519_v7 = vld [vmem:[#allocation11 + $0x6b0] sm:$0xff] }
 0x29f   : > { %2612 = vmatpush1.bf16.msra.mxu0 %v2611_v19  ;;  %v1506_v19 = vld [vmem:[#allocation11 + $0x648] sm:$0xff]  ;;  %v2499_v17 = vpack.c.bf16 %v1410_v14, %v1403_v13  ;;  %v1315_v13 = vld [vmem:[#allocation11 + $0x50] sm:$0xff] }
 0x2a0   : > { %2448 = vmatpush1.bf16.msra.mxu1 %v2447_v25  ;;  %v2615_v25 = vpack.c.bf16 %v1372_v24, %v1365_v22  ;;  %2614 = vmatprep.subr.bf16.mxu0 %v2613_v23  ;;  %v2653_v21 = vpack.c.bf16 %v1513_v20, %v1506_v19  ;;  %v1102_v22 = vld [vmem:[%s3645_s5] sm:$0x3]  ;;  %v1418_v15 = vld [vmem:[#allocation11 + $0x388] sm:$0xff]  ;;  %v1424_v20 = vld [vmem:[#allocation11 + $0x3b8] sm:$0xff] }
 0x2a1   : > { %2450 = vmatprep.subr.bf16.mxu1 %v2449_v26  ;;  %v1380_v26 = vld [vmem:[#allocation11 + $0x258] sm:$0xff]  ;;  %v1107_v23 = vrot.slane %v1102_v22, %v3491_v61  ;;  %v1111_v24 = vrot.slane %v1102_v22, %v3497_v63  ;;  %v1417_v19 = vld [vmem:[#allocation11 + $0x380] sm:$0xff]  ;;  %v1439_v22 = vld [vmem:[#allocation11 + $0x430] sm:$0xff] }
 0x2a2   : > { %v2617_v29 = vpack.c.bf16 %v1387_v27, %v1380_v26 }
 0x2a3   : > { %2616 = vmatpush1.bf16.msra.mxu0 %v2615_v25 }
 0x2a4   : > { %2452 = vmatpush1.bf16.msra.mxu1 %v2451_v31  ;;  %v2619_v31 = vpack.c.bf16 %v1386_v30, %v1379_v28  ;;  %2618 = vmatprep.subr.bf16.mxu0 %v2617_v29  ;;  %v1185_v28 = vld [vmem:[%s3462_s9] sm:$0xff]  ;;  %v1305_v30 = vld [vmem:[#allocation11] sm:$0xff]  ;;  %s3687_s9 = sld [smem:[#allocation29_spill]] }
 0x2a5   : > { %2454 = vmatprep.subr.bf16.mxu1 %v2453_v32  ;;  %v1394_v32 = vld [vmem:[#allocation11 + $0x2c8] sm:$0xff] }
 0x2a6   : > { %v2621_v34 = vpack.c.bf16 %v1401_v33, %v1394_v32  ;;  %v1320_v32 = vld [vmem:[#allocation11 + $0x78] sm:$0xff]  ;;  %v1327_v33 = vld [vmem:[#allocation11 + $0xb0] sm:$0xff] }
 0x2a7   : > { %2620 = vmatpush1.bf16.msra.mxu0 %v2619_v31  ;;  %v1312_v31 = vld [vmem:[#allocation11 + $0x38] sm:$0xff] }
 0x2a8   : > { %2456 = vmatpush1.bf16.msra.mxu1 %v2455_v36  ;;  %v2623_v36 = vpack.c.bf16 %v1400_v35, %v1393_v11  ;;  %2622 = vmatprep.subr.bf16.mxu0 %v2621_v34  ;;  %v2471_v34 = vpack.c.bf16 %v1312_v31, %v1305_v30  ;;  %v1445_v31 = vld [vmem:[#allocation11 + $0x460] sm:$0xff] }
 0x2a9   : > { %2458 = vmatprep.subr.bf16.mxu1 %v2457_v37  ;;  %v1408_v37 = vld [vmem:[#allocation11 + $0x338] sm:$0xff] }
 0x2aa   : > { %s3547_s27 = scalar_lea.hbm %s3687_s9, %s2113_s0 }
 0x2ab   : > { %2624 = vmatpush1.bf16.msra.mxu0 %v2623_v36  ;;  %v2473_v36 = vpack.c.bf16 %v1327_v33, %v1320_v32  ;;  %v1452_v32 = vld [vmem:[#allocation11 + $0x498] sm:$0xff] }
 0x2ac   : > { %2460 = vmatpush1.bf16.msra.mxu1 %v2459_v40  ;;  %v2625_v40 = vpack.c.bf16 %v1415_v38, %v1408_v37  ;;  %v1319_v37 = vld [vmem:[#allocation11 + $0x70] sm:$0xff]  ;;  %v1326_v38 = vld [vmem:[#allocation11 + $0xa8] sm:$0xff]  ;;  %v1460_v33 = vld [vmem:[#allocation11 + $0x4d8] sm:$0xff] }
 0x2ad   : > { %2462 = vmatprep.subr.bf16.mxu1 %v2461_v43  ;;  %v1422_v43 = vld [vmem:[#allocation11 + $0x3a8] sm:$0xff]  ;;  %v2475_v41 = vpack.c.bf16 %v1326_v38, %v1319_v37 }
 0x2ae   : > { %2626 = vmatprep.subr.bf16.mxu0 %v2625_v40  ;;  %v1341_v40 = vld [vmem:[#allocation11 + $0x120] sm:$0xff]  ;;  %v1466_v37 = vld [vmem:[#allocation11 + $0x508] sm:$0xff] }
 0x2af   : > { %2628 = vmatpush1.bf16.msra.mxu0 %v2627_v42  ;;  %v2477_v42 = vpack.c.bf16 %v1341_v40, %v1334_v39  ;;  %v1474_v38 = vld [vmem:[#allocation11 + $0x548] sm:$0xff]  ;;  %v1481_v39 = vld [vmem:[#allocation11 + $0x580] sm:$0xff] }
 0x2b0   : > { %2464 = vmatpush1.bf16.msra.mxu1 %v2463_v46  ;;  %v2629_v46 = vpack.c.bf16 %v1429_v44, %v1422_v43  ;;  %v1333_v43 = vld [vmem:[#allocation11 + $0xe0] sm:$0xff]  ;;  %v1340_v44 = vld [vmem:[#allocation11 + $0x118] sm:$0xff] }
 0x2b1   : > { %2466 = vmatprep.subr.bf16.mxu1 %v2465_v49  ;;  %v1436_v49 = vld [vmem:[#allocation11 + $0x418] sm:$0xff]  ;;  %v2479_v47 = vpack.c.bf16 %v1340_v44, %v1333_v43 }
 0x2b2   : > { %2630 = vmatprep.subr.bf16.mxu0 %v2629_v46  ;;  %v1355_v46 = vld [vmem:[#allocation11 + $0x190] sm:$0xff]  ;;  %v1480_v43 = vld [vmem:[#allocation11 + $0x578] sm:$0xff] }
 0x2b3   : > { %2632 = vmatpush1.bf16.msra.mxu0 %v2631_v48  ;;  %v2481_v48 = vpack.c.bf16 %v1355_v46, %v1348_v45  ;;  %v1488_v44 = vld [vmem:[#allocation11 + $0x5b8] sm:$0xff]  ;;  %v1495_v45 = vld [vmem:[#allocation11 + $0x5f0] sm:$0xff] }
 0x2b4   : > { %2468 = vmatpush1.bf16.msra.mxu1 %v2467_v52  ;;  %v2633_v52 = vpack.c.bf16 %v1443_v50, %v1436_v49  ;;  %v1347_v49 = vld [vmem:[#allocation11 + $0x150] sm:$0xff]  ;;  %v1354_v50 = vld [vmem:[#allocation11 + $0x188] sm:$0xff] }
 0x2b5   : > { %2470 = vmatprep.subr.bf16.mxu1 %v2469_v55  ;;  %v1450_v55 = vld [vmem:[#allocation11 + $0x488] sm:$0xff]  ;;  %v2483_v53 = vpack.c.bf16 %v1354_v50, %v1347_v49 }
 0x2b6   : > { %2634 = vmatprep.subr.bf16.mxu0 %v2633_v52  ;;  %v2637_v58 = vpack.c.bf16 %v1457_v56, %v1450_v55  ;;  %v1369_v52 = vld [vmem:[#allocation11 + $0x200] sm:$0xff]  ;;  %v1368_v56 = vld [vmem:[#allocation11 + $0x1f8] sm:$0xff]  ;;  %v1494_v49 = vld [vmem:[#allocation11 + $0x5e8] sm:$0xff] }
 0x2b7   : > { %2636 = vmatpush1.bf16.msra.mxu0 %v2635_v54  ;;  %v2485_v54 = vpack.c.bf16 %v1369_v52, %v1362_v51  ;;  %v1361_v55 = vld [vmem:[#allocation11 + $0x1c0] sm:$0xff]  ;;  %v1502_v50 = vld [vmem:[#allocation11 + $0x628] sm:$0xff] }
 0x2b8   : > { %2638 = vmatprep.subr.bf16.mxu0 %v2637_v58  ;;  %v1383_v58 = vld [vmem:[#allocation11 + $0x270] sm:$0xff]  ;;  %v2487_v59 = vpack.c.bf16 %v1368_v56, %v1361_v55  ;;  %v1509_v51 = vld [vmem:[#allocation11 + $0x660] sm:$0xff]  ;;  %v1508_v55 = vld [vmem:[#allocation11 + $0x658] sm:$0xff] }
 0x2bb   : > { %2640 = vmatpush1.bf16.msra.mxu0 %v2639_v62  ;;  %v2489_v62 = vpack.c.bf16 %v1383_v58, %v1376_v57  ;;  %v1505_v57 = vld [vmem:[#allocation11 + $0x640] sm:$0xff]  ;;  %v1512_v58 = vld [vmem:[#allocation11 + $0x678] sm:$0xff] }
 0x2bc   : > { %2642 = vmatprep.subr.bf16.mxu0 %v2641_v3  ;;  %v1397_v3 = vld [vmem:[#allocation11 + $0x2e0] sm:$0xff] }
 0x2bf   : > { %2644 = vmatpush1.bf16.msra.mxu0 %v2643_v5  ;;  %v2493_v5 = vpack.c.bf16 %v1397_v3, %v1390_v2  ;;  %v1515_v2 = vld [vmem:[#allocation11 + $0x690] sm:$0xff]  ;;  %v1522_v3 = vld [vmem:[#allocation11 + $0x6c8] sm:$0xff] }
 0x2c0   : > { %2646 = vmatprep.subr.bf16.mxu0 %v2645_v9  ;;  %v1411_v9 = vld [vmem:[#allocation11 + $0x350] sm:$0xff] }
 0x2c3   : > { %2648 = vmatpush1.bf16.msra.mxu0 %v2647_v12  ;;  %v2497_v12 = vpack.c.bf16 %v1411_v9, %v1404_v8  ;;  %v1526_v8 = vld [vmem:[#allocation11 + $0x6e8] sm:$0xff] }
 0x2c4   : > { %2650 = vmatprep.subr.bf16.mxu0 %v2649_v16  ;;  %v1425_v16 = vld [vmem:[#allocation11 + $0x3c0] sm:$0xff] }
 0x2c7   : > { %2652 = vmatpush1.bf16.msra.mxu0 %v2651_v18  ;;  %v2501_v18 = vpack.c.bf16 %v1425_v16, %v1418_v15  ;;  %v1220_v15 = vld [vmem:[%s3647_s7] sm:$0x3] }
 0x2c8   : > { %2654 = vmatprep.subr.bf16.mxu0 %v2653_v21  ;;  %v1432_v21 = vld [vmem:[#allocation11 + $0x3f8] sm:$0xff]  ;;  %v1225_v16 = vrot.slane %v1220_v15, %v3491_v61 }
 0x36a   : > { %v1180_v25 = vpop.f32.mrb[0].mxu1 }
 0x36b   : > { %v1181_v26 = vadd.f32 %v1180_v25, %v1107_v23  ;;  %v1182_v27 = vpop.f32.mrb[1].mxu1  ;;  %v2503_v23 = vpack.c.bf16 %v1424_v20, %v1417_v19  ;;  %v1431_v25 = vld [vmem:[#allocation11 + $0x3f0] sm:$0xff] }
 0x36c   : > { %v1183_v29 = vadd.f32 %v1182_v27, %v1111_v24  ;;  %v2505_v24 = vpack.c.bf16 %v1439_v22, %v1432_v21  ;;  %v1446_v27 = vld [vmem:[#allocation11 + $0x468] sm:$0xff]  ;;  %v1307_v21 = vld [vmem:[#allocation11 + $0x10] sm:$0xff] }
 0x36d   : > { %1891 = vst [vmem:[%s3509_s2] sm:$0xff] %v1181_v26  ;;  %v1314_v22 = vld [vmem:[#allocation11 + $0x48] sm:$0xff] }
 0x36e   : > { %v1186_v11 = vmul.f32 %v1185_v28, %v1183_v29  ;;  %1892 = vst [vmem:[%s3509_s2 + $0x8] sm:$0xff] %v1183_v29  ;;  %v1453_v28 = vld [vmem:[#allocation11 + $0x4a0] sm:$0xff] }
 0x36f   : > { %v2509_v30 = vpack.c.bf16 %v1453_v28, %v1446_v27  ;;  %v2535_v27 = vpack.c.bf16 %v1314_v22, %v1307_v21 }
 0x370   : > { %v1187_v35 = vadd.f32 %v1186_v11, %v1181_v26  ;;  %v1438_v26 = vld [vmem:[#allocation11 + $0x428] sm:$0xff]  ;;  %v1467_v11 = vld [vmem:[#allocation11 + $0x510] sm:$0xff] }
 0x371   : > { %v2507_v29 = vpack.c.bf16 %v1438_v26, %v1431_v25  ;;  %v1329_v25 = vld [vmem:[#allocation11 + $0xc0] sm:$0xff] }
 0x372   : > { %1297 = vmatmul.mubr.f32.vlgmr.msra.gmra.mrb[2].mxu1 %v1187_v35  ;;  %v2513_v35 = vpack.c.bf16 %v1467_v11, %v1460_v33  ;;  %v1343_v33 = vld [vmem:[#allocation11 + $0x130] sm:$0xff] }
 0x373   : > { %2472 = vmatpush1.bf16.msra.mxu1 %v2471_v34  ;;  %v2511_v34 = vpack.c.bf16 %v1452_v32, %v1445_v31  ;;  %v1328_v31 = vld [vmem:[#allocation11 + $0xb8] sm:$0xff] }
 0x374   : > { %2474 = vmatprep.subr.bf16.mxu1 %v2473_v36  ;;  %v1459_v36 = vld [vmem:[#allocation11 + $0x4d0] sm:$0xff]  ;;  %v1336_v32 = vld [vmem:[#allocation11 + $0xf8] sm:$0xff] }
 0x375   : > { %v2515_v40 = vpack.c.bf16 %v1466_v37, %v1459_v36  ;;  %v1342_v36 = vld [vmem:[#allocation11 + $0x128] sm:$0xff] }
 0x376   : > { %v1350_v37 = vld [vmem:[#allocation11 + $0x168] sm:$0xff] }
 0x377   : > { %2476 = vmatpush1.bf16.msra.mxu1 %v2475_v41  ;;  %v2517_v41 = vpack.c.bf16 %v1481_v39, %v1474_v38  ;;  %v1357_v38 = vld [vmem:[#allocation11 + $0x1a0] sm:$0xff] }
 0x378   : > { %2478 = vmatprep.subr.bf16.mxu1 %v2477_v42  ;;  %v1473_v42 = vld [vmem:[#allocation11 + $0x540] sm:$0xff] }
 0x379   : > { %v2519_v46 = vpack.c.bf16 %v1480_v43, %v1473_v42  ;;  %v1356_v42 = vld [vmem:[#allocation11 + $0x198] sm:$0xff] }
 0x37a   : > { %v1364_v43 = vld [vmem:[#allocation11 + $0x1d8] sm:$0xff] }
 0x37b   : > { %2480 = vmatpush1.bf16.msra.mxu1 %v2479_v47  ;;  %v2521_v47 = vpack.c.bf16 %v1495_v45, %v1488_v44  ;;  %v1371_v44 = vld [vmem:[#allocation11 + $0x210] sm:$0xff] }
 0x37c   : > { %2482 = vmatprep.subr.bf16.mxu1 %v2481_v48  ;;  %v1487_v48 = vld [vmem:[#allocation11 + $0x5b0] sm:$0xff] }
 0x37d   : > { %v2523_v52 = vpack.c.bf16 %v1494_v49, %v1487_v48  ;;  %v1370_v48 = vld [vmem:[#allocation11 + $0x208] sm:$0xff] }
 0x37e   : > { %v1378_v49 = vld [vmem:[#allocation11 + $0x248] sm:$0xff] }
 0x37f   : > { %2484 = vmatpush1.bf16.msra.mxu1 %v2483_v53  ;;  %v2525_v53 = vpack.c.bf16 %v1509_v51, %v1502_v50  ;;  %v1385_v50 = vld [vmem:[#allocation11 + $0x280] sm:$0xff] }
 0x380   : > { %2486 = vmatprep.subr.bf16.mxu1 %v2485_v54  ;;  %v1501_v54 = vld [vmem:[#allocation11 + $0x620] sm:$0xff] }
 0x381   : > { %v2527_v56 = vpack.c.bf16 %v1508_v55, %v1501_v54  ;;  %v1384_v54 = vld [vmem:[#allocation11 + $0x278] sm:$0xff] }
 0x382   : > { %v1392_v55 = vld [vmem:[#allocation11 + $0x2b8] sm:$0xff] }
 0x383   : > { %2488 = vmatpush1.bf16.msra.mxu1 %v2487_v59  ;;  %v2655_v59 = vpack.c.bf16 %v1512_v58, %v1505_v57 }
 0x384   : > { %2490 = vmatprep.subr.bf16.mxu1 %v2489_v62  ;;  %v1516_v62 = vld [vmem:[#allocation11 + $0x698] sm:$0xff] }
 0x385   : > { %2656 = vmatpush1.bf16.msra.mxu0 %v2655_v59  ;;  %v2529_v1 = vpack.c.bf16 %v1523_v0, %v1516_v62  ;;  %v1391_v59 = vld [vmem:[#allocation11 + $0x2b0] sm:$0xff]  ;;  %v1398_v62 = vld [vmem:[#allocation11 + $0x2e8] sm:$0xff] }
 0x386   : > { %v1406_v0 = vld [vmem:[#allocation11 + $0x328] sm:$0xff] }
 0x387   : > { %2492 = vmatpush1.bf16.msra.mxu1 %v2491_v4  ;;  %v1520_v4 = vld [vmem:[#allocation11 + $0x6b8] sm:$0xff] }
 0x388   : > { %2494 = vmatprep.subr.bf16.mxu1 %v2493_v5  ;;  %v2531_v5 = vpack.c.bf16 %v1522_v3, %v1515_v2  ;;  %v2657_v9 = vpack.c.bf16 %v1527_v6, %v1520_v4  ;;  %v2559_v2 = vpack.c.bf16 %v1398_v62, %v1391_v59  ;;  %v1405_v4 = vld [vmem:[#allocation11 + $0x320] sm:$0xff]  ;;  %v1420_v6 = vld [vmem:[#allocation11 + $0x398] sm:$0xff]  ;;  %v1311_v62 = vld [vmem:[#allocation11 + $0x30] sm:$0xff] }
 0x38a   : > { %2658 = vmatprep.subr.bf16.mxu0 %v2657_v9 }
 0x38b   : > { %2496 = vmatpush1.bf16.msra.mxu1 %v2495_v10  ;;  %v2659_v10 = vpack.c.bf16 %v1526_v8, %v1519_v7  ;;  %v1427_v7 = vld [vmem:[#allocation11 + $0x3d0] sm:$0xff] }
 0x38c   : > { %2498 = vmatprep.subr.bf16.mxu1 %v2497_v12  ;;  %v1308_v12 = vld [vmem:[#allocation11 + $0x18] sm:$0xff]  ;;  %v2565_v9 = vpack.c.bf16 %v1427_v7, %v1420_v6  ;;  %v1451_v7 = vld [vmem:[#allocation11 + $0x490] sm:$0xff] }
 0x38d   : > { %v2533_v14 = vpack.c.bf16 %v1315_v13, %v1308_v12  ;;  %2660 = vmatpush1.bf16.msra.mxu0 %v2659_v10  ;;  %v1419_v10 = vld [vmem:[#allocation11 + $0x390] sm:$0xff]  ;;  %v1426_v12 = vld [vmem:[#allocation11 + $0x3c8] sm:$0xff]  ;;  %v1332_v6 = vld [vmem:[#allocation11 + $0xd8] sm:$0xff] }
 0x38e   : > { %v1434_v13 = vld [vmem:[#allocation11 + $0x408] sm:$0xff] }
 0x38f   : > { %2500 = vmatpush1.bf16.msra.mxu1 %v2499_v17  ;;  %v1229_v17 = vrot.slane %v1220_v15, %v3497_v63  ;;  %v2567_v15 = vpack.c.bf16 %v1426_v12, %v1419_v10  ;;  %v1339_v12 = vld [vmem:[#allocation11 + $0x110] sm:$0xff] }
 0x390   : > { %2502 = vmatprep.subr.bf16.mxu1 %v2501_v18 }
 0x393   : > { %2504 = vmatpush1.bf16.msra.mxu1 %v2503_v23 }
 0x394   : > { %2506 = vmatprep.subr.bf16.mxu1 %v2505_v24  ;;  %v1322_v24 = vld [vmem:[#allocation11 + $0x88] sm:$0xff] }
 0x397   : > { %2508 = vmatpush1.bf16.msra.mxu1 %v2507_v29  ;;  %v2537_v29 = vpack.c.bf16 %v1329_v25, %v1322_v24  ;;  %v1454_v24 = vld [vmem:[#allocation11 + $0x4a8] sm:$0xff] }
 0x398   : > { %2510 = vmatprep.subr.bf16.mxu1 %v2509_v30  ;;  %v1321_v30 = vld [vmem:[#allocation11 + $0x80] sm:$0xff]  ;;  %v1462_v25 = vld [vmem:[#allocation11 + $0x4e8] sm:$0xff] }
 0x399   : > { %v2539_v11 = vpack.c.bf16 %v1328_v31, %v1321_v30  ;;  %v1461_v31 = vld [vmem:[#allocation11 + $0x4e0] sm:$0xff] }
 0x39b   : > { %2512 = vmatpush1.bf16.msra.mxu1 %v2511_v34  ;;  %v2541_v34 = vpack.c.bf16 %v1343_v33, %v1336_v32  ;;  %v1468_v32 = vld [vmem:[#allocation11 + $0x518] sm:$0xff] }
 0x39c   : > { %2514 = vmatprep.subr.bf16.mxu1 %v2513_v35  ;;  %v1335_v35 = vld [vmem:[#allocation11 + $0xf0] sm:$0xff]  ;;  %v1476_v33 = vld [vmem:[#allocation11 + $0x558] sm:$0xff] }
 0x39d   : > { %v2543_v39 = vpack.c.bf16 %v1342_v36, %v1335_v35  ;;  %v1475_v36 = vld [vmem:[#allocation11 + $0x550] sm:$0xff] }
 0x39f   : > { %2516 = vmatpush1.bf16.msra.mxu1 %v2515_v40  ;;  %v2545_v40 = vpack.c.bf16 %v1357_v38, %v1350_v37  ;;  %v1482_v37 = vld [vmem:[#allocation11 + $0x588] sm:$0xff] }
 0x3a0   : > { %2518 = vmatprep.subr.bf16.mxu1 %v2517_v41  ;;  %v1349_v41 = vld [vmem:[#allocation11 + $0x160] sm:$0xff]  ;;  %v1490_v38 = vld [vmem:[#allocation11 + $0x5c8] sm:$0xff] }
 0x3a1   : > { %v2547_v45 = vpack.c.bf16 %v1356_v42, %v1349_v41  ;;  %v1489_v42 = vld [vmem:[#allocation11 + $0x5c0] sm:$0xff] }
 0x3a3   : > { %2520 = vmatpush1.bf16.msra.mxu1 %v2519_v46  ;;  %v2549_v46 = vpack.c.bf16 %v1371_v44, %v1364_v43  ;;  %v1496_v43 = vld [vmem:[#allocation11 + $0x5f8] sm:$0xff] }
 0x3a4   : > { %2522 = vmatprep.subr.bf16.mxu1 %v2521_v47  ;;  %v1363_v47 = vld [vmem:[#allocation11 + $0x1d0] sm:$0xff]  ;;  %v1504_v44 = vld [vmem:[#allocation11 + $0x638] sm:$0xff] }
 0x3a5   : > { %v2551_v51 = vpack.c.bf16 %v1370_v48, %v1363_v47  ;;  %v1503_v48 = vld [vmem:[#allocation11 + $0x630] sm:$0xff] }
 0x3a7   : > { %2524 = vmatpush1.bf16.msra.mxu1 %v2523_v52  ;;  %v2553_v52 = vpack.c.bf16 %v1385_v50, %v1378_v49  ;;  %v1510_v49 = vld [vmem:[#allocation11 + $0x668] sm:$0xff] }
 0x3a8   : > { %2526 = vmatprep.subr.bf16.mxu1 %v2525_v53  ;;  %v1377_v53 = vld [vmem:[#allocation11 + $0x240] sm:$0xff]  ;;  %v1518_v50 = vld [vmem:[#allocation11 + $0x6a8] sm:$0xff] }
 0x3a9   : > { %v2555_v57 = vpack.c.bf16 %v1384_v54, %v1377_v53  ;;  %v1517_v54 = vld [vmem:[#allocation11 + $0x6a0] sm:$0xff] }
 0x3ab   : > { %2528 = vmatpush1.bf16.msra.mxu1 %v2527_v56  ;;  %v1399_v56 = vld [vmem:[#allocation11 + $0x2f0] sm:$0xff] }
 0x3ac   : > { %2530 = vmatprep.subr.bf16.mxu1 %v2529_v1  ;;  %v2557_v58 = vpack.c.bf16 %v1399_v56, %v1392_v55  ;;  %v1413_v1 = vld [vmem:[#allocation11 + $0x360] sm:$0xff]  ;;  %v1524_v55 = vld [vmem:[#allocation11 + $0x6d8] sm:$0xff]  ;;  %v1423_v56 = vld [vmem:[#allocation11 + $0x3b0] sm:$0xff] }
 0x3ad   : > { %v2561_v3 = vpack.c.bf16 %v1413_v1, %v1406_v0  ;;  %v1318_v0 = vld [vmem:[#allocation11 + $0x68] sm:$0xff]  ;;  %v1437_v1 = vld [vmem:[#allocation11 + $0x420] sm:$0xff] }
 0x3af   : > { %2532 = vmatpush1.bf16.msra.mxu1 %v2531_v5  ;;  %v1412_v5 = vld [vmem:[#allocation11 + $0x358] sm:$0xff] }
 0x3b0   : > { %2534 = vmatprep.subr.bf16.mxu1 %v2533_v14  ;;  %v2563_v8 = vpack.c.bf16 %v1412_v5, %v1405_v4  ;;  %v1441_v14 = vld [vmem:[#allocation11 + $0x440] sm:$0xff] }
 0x3b1   : > { %v1325_v5 = vld [vmem:[#allocation11 + $0xa0] sm:$0xff] }
 0x445   : > { %v1298_v18 = vpop.f32.mrb[2].mxu1 }
 0x446   : > { %v1299_v19 = vadd.f32 %v1298_v18, %v1225_v16  ;;  %v1300_v20 = vpop.f32.mrb[3].mxu1  ;;  %v2569_v16 = vpack.c.bf16 %v1441_v14, %v1434_v13  ;;  %v1440_v18 = vld [vmem:[#allocation11 + $0x438] sm:$0xff]  ;;  %v1346_v13 = vld [vmem:[#allocation11 + $0x148] sm:$0xff]  ;;  %v1465_v14 = vld [vmem:[#allocation11 + $0x500] sm:$0xff] }
 0x447   : > { %v1301_v23 = vadd.f32 %v1300_v20, %v1229_v17  ;;  %v1433_v17 = vld [vmem:[#allocation11 + $0x400] sm:$0xff]  ;;  %v1455_v20 = vld [vmem:[#allocation11 + $0x4b0] sm:$0xff] }
 0x448   : > { %v3520_v28 = vmax.f32 %v1299_v19, 0.0  ;;  %v1448_v19 = vld [vmem:[#allocation11 + $0x478] sm:$0xff]  ;;  %v2571_v21 = vpack.c.bf16 %v1440_v18, %v1433_v17  ;;  %v1353_v18 = vld [vmem:[#allocation11 + $0x180] sm:$0xff] }
 0x449   : > { %v3518_v26 = vmax.f32 %v1301_v23, 0.0  ;;  %v2573_v22 = vpack.c.bf16 %v1455_v20, %v1448_v19  ;;  %v1447_v23 = vld [vmem:[#allocation11 + $0x470] sm:$0xff]  ;;  %v1360_v19 = vld [vmem:[#allocation11 + $0x1b8] sm:$0xff] }
 0x44a   : > { %v1479_v20 = vld [vmem:[#allocation11 + $0x570] sm:$0xff] }
 0x44b   : > { %1630 = vmatprep.mubr.f32.mxu1 %v3518_v26  ;;  %1772 = vmatprep.mubr.f32.mxu0 %v3518_v26 }
 0x44c   : > { %1631 = vmatmul.mubr.f32.vlgmr.msra.gmra.mrb[4].mxu1 %v3520_v28  ;;  %1773 = vmatmul.mubr.f32.vlgmr.msra.gmra.mrb[2].mxu0 %v3520_v28 }
 0x44d   : > { %2536 = vmatpush1.bf16.msra.mxu1 %v2535_v27  ;;  %1701 = vmatprep.mubr.f32.mxu1 %v3518_v26  ;;  %v1469_v27 = vld [vmem:[#allocation11 + $0x520] sm:$0xff] }
 0x44e   : > { %2538 = vmatprep.subr.bf16.mxu1 %v2537_v29  ;;  %v2575_v29 = vpack.c.bf16 %v1454_v24, %v1447_v23  ;;  %v2577_v30 = vpack.c.bf16 %v1469_v27, %v1462_v25  ;;  %v1374_v24 = vld [vmem:[#allocation11 + $0x228] sm:$0xff]  ;;  %v1493_v25 = vld [vmem:[#allocation11 + $0x5e0] sm:$0xff]  ;;  %v1500_v27 = vld [vmem:[#allocation11 + $0x618] sm:$0xff] }
 0x451   : > { %2540 = vmatpush1.bf16.msra.mxu1 %v2539_v11  ;;  %v1483_v11 = vld [vmem:[#allocation11 + $0x590] sm:$0xff] }
 0x452   : > { %2542 = vmatprep.subr.bf16.mxu1 %v2541_v34  ;;  %v2579_v34 = vpack.c.bf16 %v1468_v32, %v1461_v31  ;;  %v2581_v35 = vpack.c.bf16 %v1483_v11, %v1476_v33  ;;  %v1381_v31 = vld [vmem:[#allocation11 + $0x260] sm:$0xff]  ;;  %v1388_v32 = vld [vmem:[#allocation11 + $0x298] sm:$0xff]  ;;  %v1507_v33 = vld [vmem:[#allocation11 + $0x650] sm:$0xff] }
 0x453   : > { %v1514_v11 = vld [vmem:[#allocation11 + $0x688] sm:$0xff] }
 0x455   : > { %2544 = vmatpush1.bf16.msra.mxu1 %v2543_v39  ;;  %v1497_v39 = vld [vmem:[#allocation11 + $0x600] sm:$0xff] }
 0x456   : > { %2546 = vmatprep.subr.bf16.mxu1 %v2545_v40  ;;  %v2583_v40 = vpack.c.bf16 %v1482_v37, %v1475_v36  ;;  %v2585_v41 = vpack.c.bf16 %v1497_v39, %v1490_v38  ;;  %v1395_v36 = vld [vmem:[#allocation11 + $0x2d0] sm:$0xff]  ;;  %v1402_v37 = vld [vmem:[#allocation11 + $0x308] sm:$0xff]  ;;  %v1521_v38 = vld [vmem:[#allocation11 + $0x6c0] sm:$0xff] }
 0x457   : > { %v1528_v39 = vld [vmem:[#allocation11 + $0x6f8] sm:$0xff] }
 0x459   : > { %2548 = vmatpush1.bf16.msra.mxu1 %v2547_v45  ;;  %v1511_v45 = vld [vmem:[#allocation11 + $0x670] sm:$0xff] }
 0x45a   : > { %2550 = vmatprep.subr.bf16.mxu1 %v2549_v46  ;;  %v2587_v46 = vpack.c.bf16 %v1496_v43, %v1489_v42  ;;  %v2589_v47 = vpack.c.bf16 %v1511_v45, %v1504_v44  ;;  %v1409_v42 = vld [vmem:[#allocation11 + $0x340] sm:$0xff]  ;;  %v1416_v43 = vld [vmem:[#allocation11 + $0x378] sm:$0xff]  ;;  %v1549_v45 = vsub.s32 4, %v3488_v60 }
 0x45b   : > { %v2691_v44 = vpack.c.bf16 %v1416_v43, %v1409_v42 }
 0x45d   : > { %2552 = vmatpush1.bf16.msra.mxu1 %v2551_v51  ;;  %v1525_v51 = vld [vmem:[#allocation11 + $0x6e0] sm:$0xff] }
 0x45e   : > { %2554 = vmatprep.subr.bf16.mxu1 %v2553_v52  ;;  %v2591_v52 = vpack.c.bf16 %v1510_v49, %v1503_v48  ;;  %v2593_v53 = vpack.c.bf16 %v1525_v51, %v1518_v50 }
 0x461   : > { %2556 = vmatpush1.bf16.msra.mxu1 %v2555_v57  ;;  %v1430_v57 = vld [vmem:[#allocation11 + $0x3e8] sm:$0xff] }
 0x462   : > { %2558 = vmatprep.subr.bf16.mxu1 %v2557_v58  ;;  %v2595_v58 = vpack.c.bf16 %v1524_v55, %v1517_v54  ;;  %v2661_v59 = vpack.c.bf16 %v1430_v57, %v1423_v56 }
 0x465   : > { %2560 = vmatpush1.bf16.msra.mxu1 %v2559_v2  ;;  %v1444_v2 = vld [vmem:[#allocation11 + $0x458] sm:$0xff] }
 0x466   : > { %2562 = vmatprep.subr.bf16.mxu1 %v2561_v3  ;;  %v2663_v3 = vpack.c.bf16 %v1318_v0, %v1311_v62  ;;  %v2665_v4 = vpack.c.bf16 %v1444_v2, %v1437_v1 }
 0x469   : > { %2564 = vmatpush1.bf16.msra.mxu1 %v2563_v8  ;;  %v1458_v8 = vld [vmem:[#allocation11 + $0x4c8] sm:$0xff] }
 0x46a   : > { %2566 = vmatprep.subr.bf16.mxu1 %v2565_v9  ;;  %v2667_v9 = vpack.c.bf16 %v1332_v6, %v1325_v5  ;;  %v2669_v10 = vpack.c.bf16 %v1458_v8, %v1451_v7 }
 0x46d   : > { %2568 = vmatpush1.bf16.msra.mxu1 %v2567_v15  ;;  %v1472_v15 = vld [vmem:[#allocation11 + $0x538] sm:$0xff] }
 0x46e   : > { %2570 = vmatprep.subr.bf16.mxu1 %v2569_v16  ;;  %v2671_v16 = vpack.c.bf16 %v1346_v13, %v1339_v12  ;;  %v2673_v17 = vpack.c.bf16 %v1472_v15, %v1465_v14 }
 0x471   : > { %2572 = vmatpush1.bf16.msra.mxu1 %v2571_v21  ;;  %v1486_v21 = vld [vmem:[#allocation11 + $0x5a8] sm:$0xff] }
 0x472   : > { %2574 = vmatprep.subr.bf16.mxu1 %v2573_v22  ;;  %v2675_v22 = vpack.c.bf16 %v1360_v19, %v1353_v18  ;;  %v2677_v23 = vpack.c.bf16 %v1486_v21, %v1479_v20 }
 0x475   : > { %2576 = vmatpush1.bf16.msra.mxu1 %v2575_v29 }
 0x476   : > { %2578 = vmatprep.subr.bf16.mxu1 %v2577_v30  ;;  %v2681_v30 = vpack.c.bf16 %v1500_v27, %v1493_v25 }
 0x479   : > { %2580 = vmatpush1.bf16.msra.mxu1 %v2579_v34  ;;  %v2683_v34 = vpack.c.bf16 %v1388_v32, %v1381_v31 }
 0x47a   : > { %2582 = vmatprep.subr.bf16.mxu1 %v2581_v35  ;;  %v2685_v35 = vpack.c.bf16 %v1514_v11, %v1507_v33 }
 0x47d   : > { %2584 = vmatpush1.bf16.msra.mxu1 %v2583_v40  ;;  %v2687_v40 = vpack.c.bf16 %v1402_v37, %v1395_v36 }
 0x47e   : > { %2586 = vmatprep.subr.bf16.mxu1 %v2585_v41  ;;  %v2689_v41 = vpack.c.bf16 %v1528_v39, %v1521_v38 }
 0x481   : > { %2588 = vmatpush1.bf16.msra.mxu1 %v2587_v46  ;;  %v3534_v46 = vld [vmem:[%s3686_s22] sm:$0xff] }
 0x482   : > { %2590 = vmatprep.subr.bf16.mxu1 %v2589_v47  ;;  %v1553_v47 = vsub.s32 5, %v3488_v60  ;;  %v1534_v48 = vrot.slane %v3534_v46, %v3491_v61  ;;  %v1550_v49 = vrot.slane %v3534_v46, %v1549_v45  ;;  %v1538_v50 = vrot.slane %v3534_v46, %v3497_v63 }
 0x485   : > { %2592 = vmatpush1.bf16.msra.mxu1 %v2591_v52 }
 0x486   : > { %2594 = vmatprep.subr.bf16.mxu1 %v2593_v53 }
 0x489   : > { %2596 = vmatpush1.bf16.msra.mxu1 %v2595_v58 }
 0x48a   : > { %2662 = vmatprep.subr.bf16.mxu1 %v2661_v59 }
 0x48c   : > { %1702 = vmatmul.mubr.f32.vlgmr.msra.gmra.mrb[6].mxu1 %v3520_v28 }
 0x48d   : > { %2664 = vmatpush3.bf16.msra.mxu1 %v2663_v3  ;;  %1843 = vmatprep.mubr.f32.mxu1 %v3518_v26  ;;  %v1367_v26 = vld [vmem:[#allocation11 + $0x1f0] sm:$0xff] }
 0x48e   : > { %2666 = vmatprep.subr.bf16.mxu1 %v2665_v4  ;;  %v2679_v29 = vpack.c.bf16 %v1374_v24, %v1367_v26 }
 0x491   : > { %2668 = vmatpush3.bf16.msra.mxu1 %v2667_v9 }
 0x492   : > { %2670 = vmatprep.subr.bf16.mxu1 %v2669_v10 }
 0x495   : > { %2672 = vmatpush3.bf16.msra.mxu1 %v2671_v16 }
 0x496   : > { %2674 = vmatprep.subr.bf16.mxu1 %v2673_v17 }
 0x499   : > { %2676 = vmatpush3.bf16.msra.mxu1 %v2675_v22 }
 0x49a   : > { %2678 = vmatprep.subr.bf16.mxu1 %v2677_v23 }
 0x49d   : > { %2680 = vmatpush3.bf16.msra.mxu1 %v2679_v29 }
 0x49e   : > { %2682 = vmatprep.subr.bf16.mxu1 %v2681_v30 }
 0x4a1   : > { %2684 = vmatpush3.bf16.msra.mxu1 %v2683_v34 }
 0x4a2   : > { %2686 = vmatprep.subr.bf16.mxu1 %v2685_v35 }
 0x4a5   : > { %2688 = vmatpush3.bf16.msra.mxu1 %v2687_v40 }
 0x4a6   : > { %2690 = vmatprep.subr.bf16.mxu1 %v2689_v41 }
 0x4a9   : > { %2692 = vmatpush3.bf16.msra.mxu1 %v2691_v44 }
 0x4ac   : > { %1844 = vmatmul.mubr.f32.vlgmr.msra.gmra.mrb[8].mxu1 %v3520_v28  ;;  %v1554_v28 = vrot.slane %v3534_v46, %v1553_v47 }
 0x51f   : > { %v1632_v51 = vpop.f32.mrb[4].mxu1  ;;  %v1774_v52 = vpop.f32.mrb[2].mxu0 }
 0x520   : > { %v1633_v53 = vadd.f32 %v1632_v51, %v1534_v48  ;;  %v1775_v54 = vadd.f32 %v1774_v52, %v1550_v49  ;;  %v1634_v55 = vpop.f32.mrb[5].mxu1  ;;  %v1776_v56 = vpop.f32.mrb[3].mxu0 }
 0x521   : > { %v1635_v57 = vadd.f32 %v1634_v55, %v1538_v50  ;;  %v1777_v58 = vadd.f32 %v1776_v56, %v1554_v28 }
 0x522   : > { %v1849_v59 = vsub.f32 0.0, %v1633_v53  ;;  %v1853_v61 = vsub.f32 0.0, %v1775_v54 }
 0x523   : > { %v1850_v62 = vsub.f32 0.0, %v1635_v57  ;;  %v1854_v0 = vsub.f32 0.0, %v1777_v58 }
 0x524   : > { %v1856_v1 = vmul.f32 1.442695, %v1849_v59  ;;  %v1864_v63 = vmul.f32 1.442695, %v1853_v61 }
 0x525   : > { %v1858_v2 = vmul.f32 1.442695, %v1850_v62  ;;  %v1866_v3 = vmul.f32 1.442695, %v1854_v0 }
 0x526   : > { %2807 = vpow2.f32 %v1856_v1 }
 0x527   : > { %3020 = shalt.err (!%p3017_p5)
}
 0x528   : > { %s3021_s2 = scalar_lea.hbm %s3547_s27, 256  ;;  %s3025_s22 = scalar_lea.hbm %s3687_s9, 512 }
 0x529   : > { %p3022_p11 = scmp.ne.s32.totalorder %s3547_s27, %s3021_s2  ;;  %p3026_p12 = scmp.lt.u32.totalorder %s3547_s27, %s3687_s9 }
 0x52a   : > { %p3027_p3 = scmp.lt.u32.totalorder %s3025_s22, %s3021_s2  ;;  %p3029_p0 = scmp.lt.u32.totalorder %s3021_s2, %s3547_s27 }
 0x52b   : > { %p3023_p1 = pnand %p3022_p11, %p3688_p2 }
 0x52c   : > { %p3028_p13 = por %p3027_p3, %p3026_p12 }
 0x52d   : > { %p3024_p9 = pneg %p3023_p1 }
 0x52e   : > { %p3030_p4 = por %p3029_p0, %p3028_p13 }
 0x530   : > { %p3031_p10 = pnand %p3030_p4, %p3024_p9 }
 0x532   : > { %3034 = shalt.err (!%p3031_p10)
}
 0x533   : > { %2726 = dma.vmem_to_hbm [thread:$0]  (%p3688_p2), %s3550_s16, 256, %s3547_s27, %s1899_s13   ;;  %2809 = vpow2.f32 %v1864_v63  ;;  %v2808_v4 = vpop.eup %2807  ;;  %v1541_v17 = vsub.s32 2, %v3488_v60  ;;  %v1545_v18 = vsub.s32 3, %v3488_v60  ;;  %v1557_v11 = vsub.s32 6, %v3488_v60 }
 0x534   : > { %2811 = vpow2.f32 %v1858_v2  ;;  %v1870_v6 = vadd.f32 1.0, %v2808_v4  ;;  %s3576_s29 = scalar_lea.vmem [#allocation13], %s2703_s4  ;;  %s2704_s4 = smul.u32 896, %s3217_s23 }
 0x535   : > { %2813 = vpow2.f32 %v1866_v3  ;;  %v1542_v19 = vrot.slane %v3534_v46, %v1541_v17  ;;  %v1546_v20 = vrot.slane %v3534_v46, %v1545_v18  ;;  %v1558_v37 = vrot.slane %v3534_v46, %v1557_v11  ;;  %s1913_s27 = sshll.u32 %s3576_s29, 4  ;;  %s3689_s14 = sld [smem:[#allocation28_spill]]  ;;  %s3597_s27 = int_to_ptr.vmem [resolvable:$true] %s1913_s27 }
 0x536   : > { %2815 = vrcp.f32 %v1870_v6  ;;  %s1894_s26 = scalar_lea.sflag [#allocation4], %s3448_s6  ;;  %s3035_s12 = scalar_lea.vmem %s3597_s27, 896 }
 0x537   : > { %p3036_p6 = scmp.ne.s32.totalorder %s3597_s27, %s3035_s12  ;;  %s3135_s23 = smov [#allocation13]  }
 0x538   : > { %s3039_s2 = sshll.u32 %s3135_s23, 4  ;;  %s3040_s2 = int_to_ptr.vmem [resolvable:$false] %s3039_s2 }
 0x539   : > { %p3037_p7 = pnand %p3036_p6, %p3688_p2  ;;  %s3041_s28 = scalar_lea.vmem %s3040_s2, 1792 }
 0x53a   : > { %p3042_p5 = scmp.lt.s32.totalorder %s3597_s27, %s3040_s2  ;;  %p3043_p11 = scmp.lt.s32.totalorder %s3041_s28, %s3035_s12 }
 0x53b   : > { %s3595_s30 = scalar_lea.hbm %s3689_s14, %s2704_s4  ;;  %p3038_p8 = pneg %p3037_p7 }
 0x53c   : > { %p3044_p1 = por %p3043_p11, %p3042_p5 }
 0x53d   : > { %v2810_v5 = vpop.eup %2809 }
 0x53e   : > { %v2812_v7 = vpop.eup %2811  ;;  %v1874_v8 = vadd.f32 1.0, %v2810_v5  ;;  %p3045_p9 = pnand %p3044_p1, %p3038_p8 }
 0x53f   : > { %v2814_v9 = vpop.eup %2813  ;;  %v1871_v10 = vadd.f32 1.0, %v2812_v7 }
 0x540   : > { %2817 = vrcp.f32 %v1874_v8  ;;  %v1875_v12 = vadd.f32 1.0, %v2814_v9  ;;  %v2816_v13 = vpop.eup %2815 }
 0x541   : > { %2819 = vrcp.f32 %v1871_v10  ;;  %1884 = vst [vmem:[%s3576_s29] sm:$0xff] %v2816_v13 }
 0x542   : > { %2821 = vrcp.f32 %v1875_v12 }
 0x54a   : > { %v2818_v14 = vpop.eup %2817 }
 0x54b   : > { %v2820_v15 = vpop.eup %2819  ;;  %1888 = vst [vmem:[%s3576_s29 + $0x20] sm:$0xff] %v2818_v14 }
 0x54c   : > { %v2822_v16 = vpop.eup %2821  ;;  %1885 = vst [vmem:[%s3576_s29 + $0x8] sm:$0xff] %v2820_v15 }
 0x54d   : > { %1889 = vst [vmem:[%s3576_s29 + $0x28] sm:$0xff] %v2822_v16 }
 0x55f   : > { %v1703_v21 = vpop.f32.mrb[6].mxu1 }
 0x560   : > { %v1704_v22 = vadd.f32 %v1703_v21, %v1542_v19  ;;  %v1705_v23 = vpop.f32.mrb[7].mxu1 }
 0x561   : > { %v1706_v26 = vadd.f32 %v1705_v23, %v1546_v20 }
 0x562   : > { %v1851_v24 = vsub.f32 0.0, %v1704_v22 }
 0x563   : > { %v1852_v25 = vsub.f32 0.0, %v1706_v26 }
 0x564   : > { %v1860_v27 = vmul.f32 1.442695, %v1851_v24 }
 0x565   : > { %v1862_v29 = vmul.f32 1.442695, %v1852_v25 }
 0x566   : > { %2823 = vpow2.f32 %v1860_v27 }
 0x567   : > { %2825 = vpow2.f32 %v1862_v29 }
 0x570   : > { %v2824_v30 = vpop.eup %2823 }
 0x571   : > { %v2826_v31 = vpop.eup %2825  ;;  %v1872_v32 = vadd.f32 1.0, %v2824_v30 }
 0x572   : > { %v1873_v33 = vadd.f32 1.0, %v2826_v31 }
 0x573   : > { %2827 = vrcp.f32 %v1872_v32 }
 0x574   : > { %2829 = vrcp.f32 %v1873_v33 }
 0x57d   : > { %v2828_v34 = vpop.eup %2827 }
 0x57e   : > { %v2830_v35 = vpop.eup %2829  ;;  %1886 = vst [vmem:[%s3576_s29 + $0x10] sm:$0xff] %v2828_v34 }
 0x57f   : > { %v2146_v36 = vpop.f32.mrb[8].mxu1  ;;  %1887 = vst [vmem:[%s3576_s29 + $0x18] sm:$0xff] %v2830_v35 }
 0x580   : > { %v2147_v38 = vpop.f32.mrb[9].mxu1 }
 0x581   : > { %v2148_v39 = vadd.f32 %v2147_v38, %v2146_v36 }
 0x583   : > { %v1846_v40 = vadd.f32 %v2148_v39, %v1558_v37 }
 0x585   : > { %v1855_v41 = vsub.f32 0.0, %v1846_v40 }
 0x587   : > { %v1868_v42 = vmul.f32 1.442695, %v1855_v41 }
 0x589   : > { %2831 = vpow2.f32 %v1868_v42 }
 0x593   : > { %v2832_v43 = vpop.eup %2831 }
 0x594   : > { %v1876_v60 = vadd.f32 1.0, %v2832_v43 }
 0x596   : > { %2833 = vrcp.f32 %v1876_v60 }
 0x5a0   : > { %v2834_v44 = vpop.eup %2833 }
 0x5a1   : > { %1890 = vst [vmem:[%s3576_s29 + $0x30] sm:$0xff] %v2834_v44 }
 0x5a2   : > { %3048 = shalt.err (!%p3045_p9)
}
 0x5a3   : > { %s3049_s6 = scalar_lea.hbm %s3595_s30, 896  ;;  %s3053_s0 = scalar_lea.hbm %s3689_s14, 1792 }
 0x5a4   : > { %p3050_p12 = scmp.ne.s32.totalorder %s3595_s30, %s3049_s6  ;;  %p3054_p0 = scmp.lt.u32.totalorder %s3595_s30, %s3689_s14 }
 0x5a5   : > { %p3055_p4 = scmp.lt.u32.totalorder %s3053_s0, %s3049_s6  ;;  %p3057_p6 = scmp.lt.u32.totalorder %s3049_s6, %s3595_s30 }
 0x5a6   : > { %p3051_p3 = pnand %p3050_p12, %p3688_p2 }
 0x5a7   : > { %p3056_p10 = por %p3055_p4, %p3054_p0 }
 0x5a8   : > { %p3052_p13 = pneg %p3051_p3 }
 0x5a9   : > { %p3058_p7 = por %p3057_p6, %p3056_p10 }
 0x5ab   : > { %p3059_p8 = pnand %p3058_p7, %p3052_p13 }
 0x5ad   : > { %3062 = shalt.err (!%p3059_p8)
}
 0x5ae   : > { %2725 = dma.vmem_to_hbm [thread:$0]  (%p3688_p2), %s3597_s27, 896, %s3595_s30, %s1894_s26  }
 0x5af PF: > { %s1939_s4 = sand.u32 1, %s3109_s17   ;;  %p3690_p5 = scmp.ne.s32.totalorder %s3674_s25, 0 }
 0x5b0   : > { %p3691_p11 = scmp.ge.s32.totalorder %s3121_s20, 2  ;;  %s1940_s16 = scalar_lea.sflag [#allocation4], %s1939_s4 }
 0x5b2   : > { %p2750_p1 = pnand %p3691_p11, %p3690_p5 }
 0x5b4   : > { %3100 = dma.done.wait (!%p2750_p1), %s1940_s16, 896  }
 0x5b5   : > { %3102 = vsyncadd (!%p2750_p1), %s1940_s16, 4294966400  ;;  %s1949_s13 = scalar_lea.sflag [#allocation15], %s1939_s4 }
 0x5b6   : > { %3104 = dma.done.wait (!%p2750_p1), %s1949_s13, 256  }
 0x5b7   : > { %3106 = vsyncadd (!%p2750_p1), %s1949_s13, 4294967040  ;;  %p33_p2 = scmp.ge.s32.totalorder %s3345_s10, 4   ;;  %s3692_s17 = smov %s3113_s18 }
 0x5b8   : > { %s3693_s18 = smov %s3117_s19  ;;  %s3694_s19 = smov %s3356_s15 }
 0x5b9   : > { %s3695_s20 = smov %s3345_s10  ;;  %35 = sbr.rel (!%p33_p2) target bundleno = 19 (0x13), region = 151 }
 0x5c0   :  { %1954 = vsyncpa [#allocation3], 1 }
 0x5c1   :  { %1956 = vsyncpa [#allocation3 + $0x1], 1 }
 0x5c2   :  { %1957 = vsyncpa [#allocation6], 1 }
 0x5c3   :  { %1959 = vsyncpa [#allocation6 + $0x1], 1 }
 0x5c4   :  { %1960 = vsyncpa [#allocation9], 1 }
 0x5c5   :  { %1961 = vsyncpa [#allocation12], 1 }
 0x5c6   :  { %1962 = vsyncpa [#allocation4], 1 }
 0x5c7   :  { %1964 = vsyncpa [#allocation4 + $0x1], 1 }
 0x5c8   :  { %1965 = vsyncpa [#allocation15], 1 }
 0x5c9   :  { %1967 = vsyncpa [#allocation15 + $0x1], 1 }

</bundles_post_ra>
